<compile_context>
chip_gen: v7x
topology: tpu7x:2x2x1
jax: 0.10.0
libtpu: 0.0.40
codegen_flags: <defaults>
</compile_context>

<pallas_src>
import functools

import jax
import jax.numpy as jnp
from jax.experimental import pallas as pl
from jax.experimental.pallas import tpu as pltpu


def _round_up(x, m):
    return (x + m - 1) // m * m


def _largest_divisor_tile(n, cap, step=128):
    """Largest multiple of `step` that divides `n` and is <= cap (>= step)."""
    t = min(cap, n)
    t -= t % step
    t = max(t, step)
    while t > step and n % t != 0:
        t -= step
    return t


def _vmem_limit_bytes():
    """Chip-aware scoped-VMEM budget: ~3/4 of physical VMEM, capped at 100 MiB."""
    try:
        cap = pltpu.get_tpu_info().vmem_capacity_bytes
    except Exception:
        cap = 64 * 1024 * 1024          # conservative (v7x per-TC VMEM)
    return int(min(cap * 3 // 4, 100 * 1024 * 1024))


def _plan_tiles(n_pad, f_out_pad, out_itemsize, vmem_limit):
    """Pick (tm, tk): big tiles for the mem-bound aggregation, VMEM-bounded,
    with tm <= n_pad/2 so the parallel row axis keeps >=2 steps (v7x 2 TCs)."""
    tm = min(512, n_pad // 2)
    tk = _largest_divisor_tile(n_pad, 2048)

    def vmem_bytes(tm_, tk_):
        a_tiles = 2 * tm_ * tk_ * 2                 # double-buffered A (bf16)
        xw_res = n_pad * f_out_pad * 2              # VMEM-resident XW (bf16)
        acc = tm_ * f_out_pad * 4                   # f32 accumulator scratch
        out_tiles = 2 * tm_ * f_out_pad * out_itemsize
        bias = 2 * 8 * f_out_pad * 4
        return a_tiles + xw_res + acc + out_tiles + bias

    while vmem_bytes(tm, tk) > vmem_limit and tk > 128:
        tk = _largest_divisor_tile(n_pad, tk - 128)
    while vmem_bytes(tm, tk) > vmem_limit and tm > 128:
        tm = _largest_divisor_tile(n_pad, tm - 128)
    return tm, tk


# ----------------------------- Pallas kernel --------------------------------

def aggregate_kernel(a_ref, xw_ref, b_ref, o_ref, acc_ref, *, tk, apply_relu):
    """out[i] = [ReLU](sum_k A[i, k-tile] @ XW[k-tile] + b); f32 accumulator.

    xw_ref holds the FULL [n_pad, f_out_pad] XW array resident in VMEM; the
    current reduction chunk is sliced in-kernel (no per-row-tile HBM re-read).
    """
    k = pl.program_id(1)

    @pl.when(k == 0)
    def _():
        acc_ref[...] = jnp.zeros_like(acc_ref)

    off = pl.multiple_of(k * tk, tk)
    acc_ref[...] += jnp.dot(
        a_ref[...], xw_ref[pl.ds(off, tk), :],
        preferred_element_type=jnp.float32,
    )

    # Bias + ReLU only once per output tile, on the final reduction step.
    @pl.when(k == pl.num_programs(1) - 1)
    def _():
        h = acc_ref[...] + b_ref[...]
        if apply_relu:
            h = jnp.maximum(h, 0.0)
        o_ref[...] = h.astype(o_ref.dtype)


def aggregate(a_bf16, xw_bf16, b_f32, *, tm, tk, apply_relu, out_dtype,
              vmem_limit):
    """A_hat @ XW + b (+ReLU), tiled over (row tiles, reduction tiles)."""
    n_pad = a_bf16.shape[0]
    f_out_pad = xw_bf16.shape[1]
    kernel = functools.partial(aggregate_kernel, tk=tk, apply_relu=apply_relu)
    out_bytes = n_pad * f_out_pad * jnp.dtype(out_dtype).itemsize
    return pl.pallas_call(
        kernel,
        out_shape=jax.ShapeDtypeStruct((n_pad, f_out_pad), out_dtype),
        grid=(n_pad // tm, n_pad // tk),
        in_specs=[
            # A_hat row x reduction tile (streamed from HBM, double-buffered).
            pl.BlockSpec((tm, tk), lambda i, k: (i, k)),
            # XW: full array, constant index_map -> DMA'd once, VMEM-resident.
            pl.BlockSpec((n_pad, f_out_pad), lambda i, k: (0, 0)),
            # Bias row.
            pl.BlockSpec((1, f_out_pad), lambda i, k: (0, 0)),
        ],
        out_specs=pl.BlockSpec((tm, f_out_pad), lambda i, k: (i, 0)),
        scratch_shapes=[pltpu.VMEM((tm, f_out_pad), jnp.float32)],
        compiler_params=pltpu.CompilerParams(
            dimension_semantics=("parallel", "arbitrary"),
            vmem_limit_bytes=vmem_limit,
        ),
        cost_estimate=pl.CostEstimate(
            flops=2 * n_pad * n_pad * f_out_pad,
            transcendentals=0,
            bytes_accessed=(2 * n_pad * n_pad            # A_hat (bf16), streamed once
                            + 2 * n_pad * f_out_pad      # XW (bf16), read once
                            + 4 * f_out_pad              # bias
                            + out_bytes),
        ),
    )(a_bf16, xw_bf16, b_f32)


def gcn_layer(a_hat, x_bf16, w, b, *, tm, tk, apply_relu, out_dtype,
              vmem_limit):
    """One GCN layer: [ReLU](A_hat @ (X @ W) + b) on padded operands."""
    n_pad = a_hat.shape[0]
    f_in, f_out = w.shape
    f_out_pad = _round_up(f_out, 128)   # keep 128-wide: kernel is HBM-bound on A

    # Cheap feature transform X @ W: tiny and mem-bound on X, left to XLA so
    # the whole VMEM budget goes to the O(N^2 * F_out) aggregation kernel.
    xw = jnp.dot(x_bf16[:, :f_in], w.astype(jnp.bfloat16),
                 preferred_element_type=jnp.float32)
    xw_pad = jnp.zeros((n_pad, f_out_pad), jnp.bfloat16)
    xw_pad = xw_pad.at[:xw.shape[0], :f_out].set(xw.astype(jnp.bfloat16))

    b_pad = jnp.zeros((1, f_out_pad), jnp.float32)
    b_pad = b_pad.at[0, :f_out].set(b.astype(jnp.float32))

    return aggregate(a_hat, xw_pad, b_pad, tm=tm, tk=tk,
                     apply_relu=apply_relu, out_dtype=out_dtype,
                     vmem_limit=vmem_limit)


# ------------------------------ Plain-JAX glue ------------------------------

def build_normalized_adjacency(edge_index, num_nodes, n_pad):
    """A_hat = D^{-1/2}(A + I)D^{-1/2} as bf16, zero-padded to [n_pad, n_pad].

    Built directly in symmetric, self-looped, binary form: scatter 1.0 for
    both edge directions plus the diagonal, f32 row-sums for degrees, bf16
    scaling — no dense f32 N x N intermediate, transpose, or eye temporaries.
    """
    src = edge_index[0].astype(jnp.int32)
    dst = edge_index[1].astype(jnp.int32)
    diag = jnp.arange(num_nodes, dtype=jnp.int32)
    rows = jnp.concatenate([src, dst, diag])
    cols = jnp.concatenate([dst, src, diag])

    a = jnp.zeros((num_nodes, num_nodes), jnp.bfloat16)
    # NOTE: duplicate / bidirectional edges collapse to weight 1.0 (binary A),
    # and the diagonal is exactly 1.0 (one self-loop per node).
    a = a.at[rows, cols].set(1.0)

    deg = jnp.sum(a, axis=1, dtype=jnp.float32)        # exact: entries are 0/1
    d_inv_sqrt = jnp.where(deg > 0, jax.lax.rsqrt(deg), 0.0).astype(jnp.bfloat16)
    a_hat = a * d_inv_sqrt[:, None] * d_inv_sqrt[None, :]
    return jnp.pad(a_hat, ((0, n_pad - num_nodes), (0, n_pad - num_nodes)))


def init_params(key, dim_in, dim_hidden, dim_out):
    k1, k2 = jax.random.split(key)
    w1 = (jax.random.normal(k1, (dim_in, dim_hidden), jnp.float32)
          / jnp.sqrt(jnp.float32(dim_in)))
    b1 = jnp.zeros((dim_hidden,), jnp.float32)
    w2 = (jax.random.normal(k2, (dim_hidden, dim_out), jnp.float32)
          / jnp.sqrt(jnp.float32(dim_hidden)))
    b2 = jnp.zeros((dim_out,), jnp.float32)
    return {"w1": w1, "b1": b1, "w2": w2, "b2": b2}


def net_forward(params, x, edge_index):
    """Eval-mode Net.forward: returns (z, edge_emb=None, masked_edge_index)."""
    n, _ = x.shape
    dim_hidden = params["w1"].shape[1]
    dim_out = params["w2"].shape[1]

    # Tile plan: large N-padding and tiles (mem-bound on streaming A_hat),
    # bounded by a chip-dependent VMEM budget, >=2 row tiles for v7x megacore.
    n_pad = _round_up(n, 512)
    f_out_pad = _round_up(max(dim_hidden, dim_out), 128)
    vmem_limit = _vmem_limit_bytes()
    tm, tk = _plan_tiles(n_pad, f_out_pad, 4, vmem_limit)

    a_hat = build_normalized_adjacency(edge_index, n, n_pad)
    x_bf = x.astype(jnp.bfloat16)

    h = gcn_layer(a_hat, x_bf, params["w1"], params["b1"], tm=tm, tk=tk,
                  apply_relu=True, out_dtype=jnp.bfloat16,
                  vmem_limit=vmem_limit)
    z_pad = gcn_layer(a_hat, h, params["w2"], params["b2"], tm=tm, tk=tk,
                      apply_relu=False, out_dtype=jnp.float32,
                      vmem_limit=vmem_limit)

    z = z_pad[:n, :dim_out]
    # Dropout between layers is identity in eval mode.
    return z, None, edge_index


# ---------------------------------- Main ------------------------------------

if __name__ == "__main__":
    num_nodes = 8
    dim_in = 32
    dim_hidden = 32
    dim_out = 16
    num_edges = 16

    key = jax.random.PRNGKey(0)
    k_x, k_src, k_dst, k_params = jax.random.split(key, 4)

    x = jax.random.normal(k_x, (num_nodes, dim_in), jnp.float32)
    src = jax.random.randint(k_src, (num_edges,), 0, num_nodes, jnp.int32)
    dst = jax.random.randint(k_dst, (num_edges,), 0, num_nodes, jnp.int32)
    edge_index = jnp.stack([src, dst], axis=0)   # [2, E]

    params = init_params(k_params, dim_in, dim_hidden, dim_out)

    fwd = jax.jit(net_forward)
    z, edge_emb, masked_edge_index = fwd(params, x, edge_index)
    z = jax.block_until_ready(z)

    assert z.shape == (num_nodes, dim_out)
    assert edge_emb is None
    assert masked_edge_index.shape == (2, num_edges)
    assert bool(jnp.all(jnp.isfinite(z)))
    print("KERNEL_OK")
</pallas_src>

<mosaic_0001>
module attributes {stable_mosaic.version = 11 : i64} {
  func.func @aggregate_kernel(%arg0: i32, %arg1: i32, %arg2: memref<256x512xbf16, #tpu.memory_space<vmem>>, %arg3: memref<512x128xbf16, #tpu.memory_space<vmem>>, %arg4: memref<1x128xf32, #tpu.memory_space<vmem>>, %arg5: memref<256x128xbf16, #tpu.memory_space<vmem>>, %arg6: memref<256x128xf32, #tpu.memory_space<vmem>>) attributes {dimension_semantics = [#tpu.dimension_semantics<parallel>, #tpu.dimension_semantics<arbitrary>], iteration_bounds = array<i64: 2, 1>, scalar_prefetch = 0 : i64, scratch_operands = 1 : i64, tpu.core_type = #tpu.core_type<tc>, window_params = [{transform_indices = @transform_0, window_bounds = array<i64: 256, 512>}, {pipeline_mode = #tpu.pipeline_mode<synchronous>, transform_indices = @transform_1, window_bounds = array<i64: 512, 128>}, {pipeline_mode = #tpu.pipeline_mode<synchronous>, transform_indices = @transform_2, window_bounds = array<i64: 1, 128>}, {transform_indices = @transform_3, window_bounds = array<i64: 256, 128>}]} {
    %c0_i32 = arith.constant 0 : i32
    %0 = arith.cmpi eq, %arg1, %c0_i32 : i32
    %1 = arith.extui %0 : i1 to i32
    %c0_i32_0 = arith.constant 0 : i32
    %2 = arith.cmpi ne, %1, %c0_i32_0 : i32
    scf.if %2 {
      %cst_9 = arith.constant 0.000000e+00 : f32
      %15 = vector.broadcast %cst_9 : f32 to vector<256x128xf32>
      %c0_10 = arith.constant 0 : index
      %c0_11 = arith.constant 0 : index
      %16 = vector.load %arg6[%c0_10, %c0_11] : memref<256x128xf32, #tpu.memory_space<vmem>>, vector<256x128xf32>
      tpu.vector_store %arg6[%c0_10, %c0_11], %15 {strides = array<i32>} : memref<256x128xf32, #tpu.memory_space<vmem>>, vector<256x128xf32>,
    } else {
    }
    %c512_i32 = arith.constant 512 : i32
    %3 = arith.muli %arg1, %c512_i32 : i32
    %4 = tpu.assume_multiple %3, 512 : i32
    %c0 = arith.constant 0 : index
    %c0_1 = arith.constant 0 : index
    %5 = vector.load %arg6[%c0, %c0_1] : memref<256x128xf32, #tpu.memory_space<vmem>>, vector<256x128xf32>
    %c0_2 = arith.constant 0 : index
    %c0_3 = arith.constant 0 : index
    %6 = vector.load %arg2[%c0_2, %c0_3] : memref<256x512xbf16, #tpu.memory_space<vmem>>, vector<256x512xbf16>
    %7 = arith.index_cast %4 : i32 to index
    %c0_4 = arith.constant 0 : index
    %8 = vector.load %arg3[%7, %c0_4] : memref<512x128xbf16, #tpu.memory_space<vmem>>, vector<512x128xbf16>
    %cst = arith.constant dense<0.000000e+00> : vector<256x128xf32>
    %9 = tpu.matmul %6, %8, %cst {dimension_numbers = #tpu.dot_dimension_numbers<[1], [0], [0], [1], [0, 0, 1, 1], [], []>} : vector<256x512xbf16>, vector<512x128xbf16>, vector<256x128xf32> -> vector<256x128xf32>
    %10 = arith.addf %5, %9 : vector<256x128xf32>
    %c0_5 = arith.constant 0 : index
    %c0_6 = arith.constant 0 : index
    %11 = vector.load %arg6[%c0_5, %c0_6] : memref<256x128xf32, #tpu.memory_space<vmem>>, vector<256x128xf32>
    tpu.vector_store %arg6[%c0_5, %c0_6], %10 {strides = array<i32>} : memref<256x128xf32, #tpu.memory_space<vmem>>, vector<256x128xf32>,
    %c0_i32_7 = arith.constant 0 : i32
    %12 = arith.cmpi eq, %arg1, %c0_i32_7 : i32
    %13 = arith.extui %12 : i1 to i32
    %c0_i32_8 = arith.constant 0 : i32
    %14 = arith.cmpi ne, %13, %c0_i32_8 : i32
    scf.if %14 {
      %c0_9 = arith.constant 0 : index
      %c0_10 = arith.constant 0 : index
      %15 = vector.load %arg6[%c0_9, %c0_10] : memref<256x128xf32, #tpu.memory_space<vmem>>, vector<256x128xf32>
      %c0_11 = arith.constant 0 : index
      %c0_12 = arith.constant 0 : index
      %16 = vector.load %arg4[%c0_11, %c0_12] : memref<1x128xf32, #tpu.memory_space<vmem>>, vector<1x128xf32>
      %17 = vector.broadcast %16 : vector<1x128xf32> to vector<256x128xf32>
      %18 = arith.addf %15, %17 : vector<256x128xf32>
      %cst_13 = arith.constant 0.000000e+00 : f32
      %19 = vector.broadcast %cst_13 : f32 to vector<256x128xf32>
      %20 = arith.maximumf %18, %19 : vector<256x128xf32>
      %21 = arith.truncf %20 : vector<256x128xf32> to vector<256x128xbf16>
      %c0_14 = arith.constant 0 : index
      %c0_15 = arith.constant 0 : index
      %22 = vector.load %arg5[%c0_14, %c0_15] : memref<256x128xbf16, #tpu.memory_space<vmem>>, vector<256x128xbf16>
      tpu.vector_store %arg5[%c0_14, %c0_15], %21 {strides = array<i32>} : memref<256x128xbf16, #tpu.memory_space<vmem>>, vector<256x128xbf16>,
    } else {
    }
    return
  }
  func.func @transform_0(%arg0: i32, %arg1: i32) -> (i32, i32) {
    %c0_i32 = arith.constant 0 : i32
    return %arg0, %arg1 : i32, i32
  }
  func.func @transform_1(%arg0: i32, %arg1: i32) -> (i32, i32) {
    %c0_i32 = arith.constant 0 : i32
    %c0_i32_0 = arith.constant 0 : i32
    %c0_i32_1 = arith.constant 0 : i32
    return %c0_i32, %c0_i32_0 : i32, i32
  }
  func.func @transform_2(%arg0: i32, %arg1: i32) -> (i32, i32) {
    %c0_i32 = arith.constant 0 : i32
    %c0_i32_0 = arith.constant 0 : i32
    %c0_i32_1 = arith.constant 0 : i32
    return %c0_i32, %c0_i32_0 : i32, i32
  }
  func.func @transform_3(%arg0: i32, %arg1: i32) -> (i32, i32) {
    %c0_i32 = arith.constant 0 : i32
    %c0_i32_0 = arith.constant 0 : i32
    return %arg0, %c0_i32 : i32, i32
  }
}

module attributes {stable_mosaic.version = 11 : i64} {
  func.func @aggregate_kernel(%arg0: i32, %arg1: i32, %arg2: memref<256x512xbf16, #tpu.memory_space<vmem>>, %arg3: memref<512x128xbf16, #tpu.memory_space<vmem>>, %arg4: memref<1x128xf32, #tpu.memory_space<vmem>>, %arg5: memref<256x128xf32, #tpu.memory_space<vmem>>, %arg6: memref<256x128xf32, #tpu.memory_space<vmem>>) attributes {dimension_semantics = [#tpu.dimension_semantics<parallel>, #tpu.dimension_semantics<arbitrary>], iteration_bounds = array<i64: 2, 1>, scalar_prefetch = 0 : i64, scratch_operands = 1 : i64, tpu.core_type = #tpu.core_type<tc>, window_params = [{transform_indices = @transform_0, window_bounds = array<i64: 256, 512>}, {pipeline_mode = #tpu.pipeline_mode<synchronous>, transform_indices = @transform_1, window_bounds = array<i64: 512, 128>}, {pipeline_mode = #tpu.pipeline_mode<synchronous>, transform_indices = @transform_2, window_bounds = array<i64: 1, 128>}, {transform_indices = @transform_3, window_bounds = array<i64: 256, 128>}]} {
    %c0_i32 = arith.constant 0 : i32
    %0 = arith.cmpi eq, %arg1, %c0_i32 : i32
    %1 = arith.extui %0 : i1 to i32
    %c0_i32_0 = arith.constant 0 : i32
    %2 = arith.cmpi ne, %1, %c0_i32_0 : i32
    scf.if %2 {
      %cst_9 = arith.constant 0.000000e+00 : f32
      %15 = vector.broadcast %cst_9 : f32 to vector<256x128xf32>
      %c0_10 = arith.constant 0 : index
      %c0_11 = arith.constant 0 : index
      %16 = vector.load %arg6[%c0_10, %c0_11] : memref<256x128xf32, #tpu.memory_space<vmem>>, vector<256x128xf32>
      tpu.vector_store %arg6[%c0_10, %c0_11], %15 {strides = array<i32>} : memref<256x128xf32, #tpu.memory_space<vmem>>, vector<256x128xf32>,
    } else {
    }
    %c512_i32 = arith.constant 512 : i32
    %3 = arith.muli %arg1, %c512_i32 : i32
    %4 = tpu.assume_multiple %3, 512 : i32
    %c0 = arith.constant 0 : index
    %c0_1 = arith.constant 0 : index
    %5 = vector.load %arg6[%c0, %c0_1] : memref<256x128xf32, #tpu.memory_space<vmem>>, vector<256x128xf32>
    %c0_2 = arith.constant 0 : index
    %c0_3 = arith.constant 0 : index
    %6 = vector.load %arg2[%c0_2, %c0_3] : memref<256x512xbf16, #tpu.memory_space<vmem>>, vector<256x512xbf16>
    %7 = arith.index_cast %4 : i32 to index
    %c0_4 = arith.constant 0 : index
    %8 = vector.load %arg3[%7, %c0_4] : memref<512x128xbf16, #tpu.memory_space<vmem>>, vector<512x128xbf16>
    %cst = arith.constant dense<0.000000e+00> : vector<256x128xf32>
    %9 = tpu.matmul %6, %8, %cst {dimension_numbers = #tpu.dot_dimension_numbers<[1], [0], [0], [1], [0, 0, 1, 1], [], []>} : vector<256x512xbf16>, vector<512x128xbf16>, vector<256x128xf32> -> vector<256x128xf32>
    %10 = arith.addf %5, %9 : vector<256x128xf32>
    %c0_5 = arith.constant 0 : index
    %c0_6 = arith.constant 0 : index
    %11 = vector.load %arg6[%c0_5, %c0_6] : memref<256x128xf32, #tpu.memory_space<vmem>>, vector<256x128xf32>
    tpu.vector_store %arg6[%c0_5, %c0_6], %10 {strides = array<i32>} : memref<256x128xf32, #tpu.memory_space<vmem>>, vector<256x128xf32>,
    %c0_i32_7 = arith.constant 0 : i32
    %12 = arith.cmpi eq, %arg1, %c0_i32_7 : i32
    %13 = arith.extui %12 : i1 to i32
    %c0_i32_8 = arith.constant 0 : i32
    %14 = arith.cmpi ne, %13, %c0_i32_8 : i32
    scf.if %14 {
      %c0_9 = arith.constant 0 : index
      %c0_10 = arith.constant 0 : index
      %15 = vector.load %arg6[%c0_9, %c0_10] : memref<256x128xf32, #tpu.memory_space<vmem>>, vector<256x128xf32>
      %c0_11 = arith.constant 0 : index
      %c0_12 = arith.constant 0 : index
      %16 = vector.load %arg4[%c0_11, %c0_12] : memref<1x128xf32, #tpu.memory_space<vmem>>, vector<1x128xf32>
      %17 = vector.broadcast %16 : vector<1x128xf32> to vector<256x128xf32>
      %18 = arith.addf %15, %17 : vector<256x128xf32>
      %c0_13 = arith.constant 0 : index
      %c0_14 = arith.constant 0 : index
      %19 = vector.load %arg5[%c0_13, %c0_14] : memref<256x128xf32, #tpu.memory_space<vmem>>, vector<256x128xf32>
      tpu.vector_store %arg5[%c0_13, %c0_14], %18 {strides = array<i32>} : memref<256x128xf32, #tpu.memory_space<vmem>>, vector<256x128xf32>,
    } else {
    }
    return
  }
  func.func @transform_0(%arg0: i32, %arg1: i32) -> (i32, i32) {
    %c0_i32 = arith.constant 0 : i32
    return %arg0, %arg1 : i32, i32
  }
  func.func @transform_1(%arg0: i32, %arg1: i32) -> (i32, i32) {
    %c0_i32 = arith.constant 0 : i32
    %c0_i32_0 = arith.constant 0 : i32
    %c0_i32_1 = arith.constant 0 : i32
    return %c0_i32, %c0_i32_0 : i32, i32
  }
  func.func @transform_2(%arg0: i32, %arg1: i32) -> (i32, i32) {
    %c0_i32 = arith.constant 0 : i32
    %c0_i32_0 = arith.constant 0 : i32
    %c0_i32_1 = arith.constant 0 : i32
    return %c0_i32, %c0_i32_0 : i32, i32
  }
  func.func @transform_3(%arg0: i32, %arg1: i32) -> (i32, i32) {
    %c0_i32 = arith.constant 0 : i32
    %c0_i32_0 = arith.constant 0 : i32
    return %arg0, %c0_i32 : i32, i32
  }
}

</mosaic_0001>

<bundles_post_ra>
// kernel: net_forward.2
= control target key start
LH: loop header
LB: loop body
LE: loop exit
PB: predicated region body
PF: predicated region fallthrough
CT: control target
= control target key end

     0   :  { %s2046_s12 = smov 0   ;;  %s2048_s13 = smov 0   ;;  %s2300_s0 = inlined_call_operand.vmem [shape: bf16[512,512], index: 0, kind: input, shape index: {}]   ;;  %s2301_s1 = inlined_call_operand.vmem [shape: bf16[512,128], index: 1, kind: input, shape index: {}]   ;;  %s2302_s2 = inlined_call_operand.vmem [shape: f32[1,128], index: 2, kind: input, shape index: {}]   ;;  %s2303_s3 = inlined_call_operand.vmem [shape: bf16[512,128], index: 3, kind: output, shape index: {}]  }
   0x1   :  { %s2050_s14 = smov 0  }
   0x2 LB: > { %s25_s15 = sadd.s32 1, %s2020_s13  ;;  %p1520_p0 = scmp.ge.s32.totalorder %s2024_s14, 1  ;;  %s2024_s14 = sphi %s2050_s14, %s13_s14   ;;  %s2020_s13 = sphi %s2048_s13, %s2305_s13   ;;  %s2016_s12 = sphi %s2046_s12, %s2304_s12  }
   0x3   : > { %p27_p1 = scmp.ge.s32.totalorder %s25_s15, 2  ;;  %p158_p2 = scmp.lt.s32.totalorder %s2024_s14, 3 }
   0x5   : > { %s2307_s15 = smov (%p27_p1, %s25_s15), 0  ;;  %p159_p3 = pnand %p1520_p0, %p158_p2 }
   0x6   : > { %v1874_v0 = vld [vmem:[%s2301_s1 + $0x40] sm:$0xff] (!%p159_p3)   ;;  %v1878_v4 = vld [vmem:[%s2301_s1 + $0x48] sm:$0xff] (!%p159_p3)   ;;  %v1882_v8 = vld [vmem:[%s2301_s1 + $0x50] sm:$0xff] (!%p159_p3)   ;;  %s1521_s25 = sshll.u32 (!%p159_p3), %s2016_s12, 5  ;;  %s1524_s16 = sshll.u32 (!%p159_p3), %s2016_s12, 4 }
   0x7   : > { %162 = sbr.rel (%p159_p3) target bundleno = 387 (0x183), region = 32  ;;  %v1875_v1 = vld [vmem:[%s2301_s1 + $0xc0] sm:$0xff] (!%p159_p3)   ;;  %1626 = vmatprep.subr.bf16.mxu0 (!%p159_p3), %v1874_v0  ;;  %v1879_v5 = vld [vmem:[%s2301_s1 + $0xc8] sm:$0xff] (!%p159_p3)   ;;  %v1883_v9 = vld [vmem:[%s2301_s1 + $0xd0] sm:$0xff] (!%p159_p3)   ;;  %p189_p4 = scmp.lt.s32.totalorder (!%p159_p3), %s1521_s25, 63 }
   0x8   : > { %v1876_v2 = vld [vmem:[%s2301_s1] sm:$0xff] (!%p159_p3)   ;;  %1738 = vmatprep.subr.bf16.mxu1 (!%p159_p3), %v1875_v1  ;;  %v1880_v6 = vld [vmem:[%s2301_s1 + $0x8] sm:$0xff] (!%p159_p3)   ;;  %v1884_v10 = vld [vmem:[%s2301_s1 + $0x10] sm:$0xff] (!%p159_p3)   ;;  %p200_p5 = scmp.lt.s32.totalorder (!%p159_p3), %s1524_s16, 31 }
   0x9   : > { %v1877_v3 = vld [vmem:[%s2301_s1 + $0x80] sm:$0xff] (!%p159_p3)   ;;  %1627 = vmatpush3.bf16.msra.mxu0 (!%p159_p3), %v1876_v2  ;;  %v1881_v7 = vld [vmem:[%s2301_s1 + $0x88] sm:$0xff] (!%p159_p3)   ;;  %v1885_v11 = vld [vmem:[%s2301_s1 + $0x90] sm:$0xff] (!%p159_p3)  }
   0xa   : > { %1739 = vmatpush3.bf16.msra.mxu1 (!%p159_p3), %v1877_v3  ;;  %1628 = vmatprep.subr.bf16.mxu0 (!%p159_p3), %v1878_v4  ;;  %v1886_v12 = vld [vmem:[%s2301_s1 + $0x58] sm:$0xff] (!%p159_p3)   ;;  %v1890_v16 = vld [vmem:[%s2301_s1 + $0x60] sm:$0xff] (!%p159_p3)   ;;  %v1894_v20 = vld [vmem:[%s2301_s1 + $0x68] sm:$0xff] (!%p159_p3)  }
   0xb   : > { %1740 = vmatprep.subr.bf16.mxu1 (!%p159_p3), %v1879_v5  ;;  %v1887_v13 = vld [vmem:[%s2301_s1 + $0xd8] sm:$0xff] (!%p159_p3)   ;;  %v1891_v17 = vld [vmem:[%s2301_s1 + $0xe0] sm:$0xff] (!%p159_p3)   ;;  %v1895_v21 = vld [vmem:[%s2301_s1 + $0xe8] sm:$0xff] (!%p159_p3)  }
   0xc   : > { %v1888_v14 = vld [vmem:[%s2301_s1 + $0x18] sm:$0xff] (!%p159_p3)   ;;  %v1892_v18 = vld [vmem:[%s2301_s1 + $0x20] sm:$0xff] (!%p159_p3)   ;;  %v1896_v22 = vld [vmem:[%s2301_s1 + $0x28] sm:$0xff] (!%p159_p3)  }
   0xd   : > { %1629 = vmatpush3.bf16.msra.mxu0 (!%p159_p3), %v1880_v6  ;;  %v1889_v15 = vld [vmem:[%s2301_s1 + $0x98] sm:$0xff] (!%p159_p3)   ;;  %v1893_v19 = vld [vmem:[%s2301_s1 + $0xa0] sm:$0xff] (!%p159_p3)   ;;  %v1897_v23 = vld [vmem:[%s2301_s1 + $0xa8] sm:$0xff] (!%p159_p3)  }
   0xe   : > { %1741 = vmatpush3.bf16.msra.mxu1 %v1881_v7  ;;  %1630 = vmatprep.subr.bf16.mxu0 %v1882_v8  ;;  %s2309_s25 = smov (!%p189_p4, %s1521_s25), 63  ;;  %v1898_v24 = vld [vmem:[%s2301_s1 + $0x70] sm:$0xff]   ;;  %v1902_v28 = vld [vmem:[%s2301_s1 + $0x78] sm:$0xff]   ;;  %s2311_s16 = smov (!%p200_p5, %s1524_s16), 31 }
   0xf   : > { %1742 = vmatprep.subr.bf16.mxu1 %v1883_v9  ;;  %v1899_v25 = vld [vmem:[%s2301_s1 + $0xf0] sm:$0xff]   ;;  %s1625_s26 = sshll.u32 %s2309_s25, 4  ;;  %v1903_v29 = vld [vmem:[%s2301_s1 + $0xf8] sm:$0xff]   ;;  %s1525_s12 = sshll.u32 %s2311_s16, 3 }
  0x10   : > { %v1900_v26 = vld [vmem:[%s2301_s1 + $0x30] sm:$0xff]   ;;  %s2160_s8 = scalar_lea.vmem %s2300_s0, %s1625_s26  ;;  %v1904_v30 = vld [vmem:[%s2301_s1 + $0x38] sm:$0xff]   ;;  %s2243_s21 = scalar_lea.vmem %s2303_s3, %s1525_s12 }
  0x11   : > { %1631 = vmatpush3.bf16.msra.mxu0 %v1884_v10  ;;  %v1901_v27 = vld [vmem:[%s2301_s1 + $0xb0] sm:$0xff]   ;;  %v1905_v31 = vld [vmem:[%s2301_s1 + $0xb8] sm:$0xff]  }
  0x12   : > { %1743 = vmatpush3.bf16.msra.mxu1 %v1885_v11  ;;  %1632 = vmatprep.subr.bf16.mxu0 %v1886_v12  ;;  %v1906_v32 = vld [vmem:[%s2160_s8] ss:$16 sps:$4 sm:$0xff]   ;;  %v1908_v33 = vld [vmem:[%s2160_s8 + $0x4] ss:$16 sps:$4 sm:$0xff]   ;;  %v1909_v34 = vld [vmem:[%s2160_s8 + $0x8] ss:$16 sps:$4 sm:$0xff]  }
  0x13   : > { %1744 = vmatprep.subr.bf16.mxu1 %v1887_v13  ;;  %v1911_v35 = vld [vmem:[%s2160_s8 + $0xc] ss:$16 sps:$4 sm:$0xff]   ;;  %951 = vmatprep.mubr.bf16.mxu0 %v1908_v33  ;;  %v1912_v36 = vld [vmem:[%s2160_s8 + $0x24] ss:$16 sps:$4 sm:$0xff]   ;;  %v1916_v38 = vld [vmem:[%s2160_s8 + $0x20] ss:$16 sps:$4 sm:$0xff]  }
  0x14   : > { %1112 = vmatprep.mubr.bf16.mxu1 %v1911_v35  ;;  %v1914_v37 = vld [vmem:[%s2160_s8 + $0x2c] ss:$16 sps:$4 sm:$0xff]   ;;  %v1917_v39 = vld [vmem:[%s2160_s8 + $0x28] ss:$16 sps:$4 sm:$0xff]   ;;  %v1918_v40 = vld [vmem:[%s2160_s8 + $0x44] ss:$16 sps:$4 sm:$0xff]  }
  0x15   : > { %1633 = vmatpush3.bf16.msra.mxu0 %v1888_v14  ;;  %v1920_v41 = vld [vmem:[%s2160_s8 + $0x4c] ss:$16 sps:$4 sm:$0xff]   ;;  %v1922_v42 = vld [vmem:[%s2160_s8 + $0x40] ss:$16 sps:$4 sm:$0xff]   ;;  %v1923_v43 = vld [vmem:[%s2160_s8 + $0x48] ss:$16 sps:$4 sm:$0xff]  }
  0x16   : > { %1745 = vmatpush3.bf16.msra.mxu1 %v1889_v15  ;;  %1634 = vmatprep.subr.bf16.mxu0 %v1890_v16  ;;  %v1924_v44 = vld [vmem:[%s2160_s8 + $0x64] ss:$16 sps:$4 sm:$0xff]   ;;  %v1926_v45 = vld [vmem:[%s2160_s8 + $0x6c] ss:$16 sps:$4 sm:$0xff]   ;;  %v1928_v46 = vld [vmem:[%s2160_s8 + $0x60] ss:$16 sps:$4 sm:$0xff]  }
  0x17   : > { %1746 = vmatprep.subr.bf16.mxu1 %v1891_v17  ;;  %v1929_v47 = vld [vmem:[%s2160_s8 + $0x68] ss:$16 sps:$4 sm:$0xff]   ;;  %v1930_v48 = vld [vmem:[%s2160_s8 + $0x84] ss:$16 sps:$4 sm:$0xff]   ;;  %v1932_v49 = vld [vmem:[%s2160_s8 + $0x8c] ss:$16 sps:$4 sm:$0xff]  }
  0x18   : > { %v1934_v50 = vld [vmem:[%s2160_s8 + $0x80] ss:$16 sps:$4 sm:$0xff]   ;;  %v1935_v51 = vld [vmem:[%s2160_s8 + $0x88] ss:$16 sps:$4 sm:$0xff]   ;;  %v1936_v52 = vld [vmem:[%s2160_s8 + $0xa4] ss:$16 sps:$4 sm:$0xff]  }
  0x19   : > { %1635 = vmatpush3.bf16.msra.mxu0 %v1892_v18  ;;  %v1938_v53 = vld [vmem:[%s2160_s8 + $0xac] ss:$16 sps:$4 sm:$0xff]   ;;  %v1940_v54 = vld [vmem:[%s2160_s8 + $0xa0] ss:$16 sps:$4 sm:$0xff]   ;;  %v1941_v55 = vld [vmem:[%s2160_s8 + $0xa8] ss:$16 sps:$4 sm:$0xff]  }
  0x1a   : > { %1747 = vmatpush3.bf16.msra.mxu1 %v1893_v19  ;;  %1636 = vmatprep.subr.bf16.mxu0 %v1894_v20  ;;  %v1942_v56 = vld [vmem:[%s2160_s8 + $0xc4] ss:$16 sps:$4 sm:$0xff]   ;;  %v1944_v57 = vld [vmem:[%s2160_s8 + $0xcc] ss:$16 sps:$4 sm:$0xff]   ;;  %v1946_v58 = vld [vmem:[%s2160_s8 + $0xc0] ss:$16 sps:$4 sm:$0xff]  }
  0x1b   : > { %1748 = vmatprep.subr.bf16.mxu1 %v1895_v21  ;;  %v1947_v59 = vld [vmem:[%s2160_s8 + $0xc8] ss:$16 sps:$4 sm:$0xff]   ;;  %v1948_v60 = vld [vmem:[%s2160_s8 + $0xe4] ss:$16 sps:$4 sm:$0xff]   ;;  %v1950_v61 = vld [vmem:[%s2160_s8 + $0xec] ss:$16 sps:$4 sm:$0xff]  }
  0x1c   : > { %v1952_v62 = vld [vmem:[%s2160_s8 + $0xe0] ss:$16 sps:$4 sm:$0xff]   ;;  %v1953_v63 = vld [vmem:[%s2160_s8 + $0xe8] ss:$16 sps:$4 sm:$0xff]   ;;  %v1954_v0 = vld [vmem:[%s2160_s8 + $0x104] ss:$16 sps:$4 sm:$0xff]  }
  0x1d   : > { %1637 = vmatpush3.bf16.msra.mxu0 %v1896_v22  ;;  %v1956_v1 = vld [vmem:[%s2160_s8 + $0x10c] ss:$16 sps:$4 sm:$0xff]   ;;  %v1958_v2 = vld [vmem:[%s2160_s8 + $0x100] ss:$16 sps:$4 sm:$0xff]   ;;  %v1959_v3 = vld [vmem:[%s2160_s8 + $0x108] ss:$16 sps:$4 sm:$0xff]  }
  0x1e   : > { %1749 = vmatpush3.bf16.msra.mxu1 %v1897_v23  ;;  %1638 = vmatprep.subr.bf16.mxu0 %v1898_v24  ;;  %v1960_v4 = vld [vmem:[%s2160_s8 + $0x124] ss:$16 sps:$4 sm:$0xff]   ;;  %v1962_v5 = vld [vmem:[%s2160_s8 + $0x12c] ss:$16 sps:$4 sm:$0xff]   ;;  %v1964_v6 = vld [vmem:[%s2160_s8 + $0x120] ss:$16 sps:$4 sm:$0xff]  }
  0x1f   : > { %1750 = vmatprep.subr.bf16.mxu1 %v1899_v25  ;;  %v1965_v7 = vld [vmem:[%s2160_s8 + $0x128] ss:$16 sps:$4 sm:$0xff]   ;;  %v1966_v8 = vld [vmem:[%s2160_s8 + $0x144] ss:$16 sps:$4 sm:$0xff]   ;;  %v1968_v9 = vld [vmem:[%s2160_s8 + $0x14c] ss:$16 sps:$4 sm:$0xff]  }
  0x20   : > { %v1970_v10 = vld [vmem:[%s2160_s8 + $0x140] ss:$16 sps:$4 sm:$0xff]   ;;  %v1971_v11 = vld [vmem:[%s2160_s8 + $0x148] ss:$16 sps:$4 sm:$0xff]   ;;  %v1972_v12 = vld [vmem:[%s2160_s8 + $0x164] ss:$16 sps:$4 sm:$0xff]  }
  0x21   : > { %1639 = vmatpush3.bf16.msra.mxu0 %v1900_v26  ;;  %v1974_v13 = vld [vmem:[%s2160_s8 + $0x16c] ss:$16 sps:$4 sm:$0xff]   ;;  %v1976_v14 = vld [vmem:[%s2160_s8 + $0x160] ss:$16 sps:$4 sm:$0xff]   ;;  %v1977_v15 = vld [vmem:[%s2160_s8 + $0x168] ss:$16 sps:$4 sm:$0xff]  }
  0x22   : > { %1751 = vmatpush3.bf16.msra.mxu1 %v1901_v27  ;;  %1640 = vmatprep.subr.bf16.mxu0 %v1902_v28  ;;  %v1978_v16 = vld [vmem:[%s2160_s8 + $0x184] ss:$16 sps:$4 sm:$0xff]   ;;  %v1980_v17 = vld [vmem:[%s2160_s8 + $0x18c] ss:$16 sps:$4 sm:$0xff]   ;;  %v1982_v18 = vld [vmem:[%s2160_s8 + $0x180] ss:$16 sps:$4 sm:$0xff]  }
  0x23   : > { %1752 = vmatprep.subr.bf16.mxu1 %v1903_v29  ;;  %v1983_v19 = vld [vmem:[%s2160_s8 + $0x188] ss:$16 sps:$4 sm:$0xff]   ;;  %v1984_v20 = vld [vmem:[%s2160_s8 + $0x1a4] ss:$16 sps:$4 sm:$0xff]   ;;  %v1986_v21 = vld [vmem:[%s2160_s8 + $0x1ac] ss:$16 sps:$4 sm:$0xff]  }
  0x24   : > { %v1988_v22 = vld [vmem:[%s2160_s8 + $0x1a0] ss:$16 sps:$4 sm:$0xff]   ;;  %v1989_v23 = vld [vmem:[%s2160_s8 + $0x1a8] ss:$16 sps:$4 sm:$0xff]   ;;  %v1990_v24 = vld [vmem:[%s2160_s8 + $0x1c4] ss:$16 sps:$4 sm:$0xff]  }
  0x25   : > { %1641 = vmatpush3.bf16.msra.mxu0 %v1904_v30  ;;  %v1992_v25 = vld [vmem:[%s2160_s8 + $0x1cc] ss:$16 sps:$4 sm:$0xff]   ;;  %v1994_v26 = vld [vmem:[%s2160_s8 + $0x1c0] ss:$16 sps:$4 sm:$0xff]   ;;  %v1995_v27 = vld [vmem:[%s2160_s8 + $0x1c8] ss:$16 sps:$4 sm:$0xff]  }
  0x26   : > { %1753 = vmatpush3.bf16.msra.mxu1 %v1905_v31  ;;  %v1996_v28 = vld [vmem:[%s2160_s8 + $0x1e4] ss:$16 sps:$4 sm:$0xff]   ;;  %v1998_v29 = vld [vmem:[%s2160_s8 + $0x1ec] ss:$16 sps:$4 sm:$0xff]   ;;  %v2000_v30 = vld [vmem:[%s2160_s8 + $0x1e0] ss:$16 sps:$4 sm:$0xff]  }
  0x27   : > { %v2001_v31 = vld [vmem:[%s2160_s8 + $0x1e8] ss:$16 sps:$4 sm:$0xff]  }
  0x28   : > { %952 = vmatmul.mubr.bf16.vlgmr.msra.gmra.mrb[0].mxu0 %v1906_v32 }
  0x29   : > { %1113 = vmatmul.mubr.bf16.vlgmr.msra.gmra.mrb[0].mxu1 %v1909_v34  ;;  %959 = vmatprep.mubr.bf16.mxu0 %v1912_v36 }
  0x2a   : > { %1120 = vmatprep.mubr.bf16.mxu1 %v1914_v37 }
  0x30   : > { %960 = vmatmul.mubr.bf16.gmra.mrb[4].mxu0 %v1916_v38 }
  0x31   : > { %1121 = vmatmul.mubr.bf16.gmra.mrb[4].mxu1 %v1917_v39  ;;  %967 = vmatprep.mubr.bf16.mxu0 %v1918_v40 }
  0x32   : > { %1128 = vmatprep.mubr.bf16.mxu1 %v1920_v41  ;;  %v2236_v41 = vld [vmem:[%s2302_s2] ss:$0 sm:$0xff] }
  0x38   : > { %968 = vmatmul.mubr.bf16.gmra.mrb[8].mxu0 %v1922_v42 }
  0x39   : > { %1129 = vmatmul.mubr.bf16.gmra.mrb[8].mxu1 %v1923_v43  ;;  %975 = vmatprep.mubr.bf16.mxu0 %v1924_v44 }
  0x3a   : > { %1136 = vmatprep.mubr.bf16.mxu1 %v1926_v45 }
  0x40   : > { %976 = vmatmul.mubr.bf16.gmra.mrb[12].mxu0 %v1928_v46 }
  0x41   : > { %1137 = vmatmul.mubr.bf16.gmra.mrb[12].mxu1 %v1929_v47  ;;  %983 = vmatprep.mubr.bf16.mxu0 %v1930_v48 }
  0x42   : > { %1144 = vmatprep.mubr.bf16.mxu1 %v1932_v49 }
  0x48   : > { %984 = vmatmul.mubr.bf16.gmra.mrb[16].mxu0 %v1934_v50 }
  0x49   : > { %1145 = vmatmul.mubr.bf16.gmra.mrb[16].mxu1 %v1935_v51  ;;  %991 = vmatprep.mubr.bf16.mxu0 %v1936_v52 }
  0x4a   : > { %1152 = vmatprep.mubr.bf16.mxu1 %v1938_v53 }
  0x50   : > { %992 = vmatmul.mubr.bf16.gmra.mrb[20].mxu0 %v1940_v54 }
  0x51   : > { %1153 = vmatmul.mubr.bf16.gmra.mrb[20].mxu1 %v1941_v55  ;;  %999 = vmatprep.mubr.bf16.mxu0 %v1942_v56 }
  0x52   : > { %1160 = vmatprep.mubr.bf16.mxu1 %v1944_v57 }
  0x58   : > { %1000 = vmatmul.mubr.bf16.gmra.mrb[24].mxu0 %v1946_v58 }
  0x59   : > { %1161 = vmatmul.mubr.bf16.gmra.mrb[24].mxu1 %v1947_v59  ;;  %1007 = vmatprep.mubr.bf16.mxu0 %v1948_v60 }
  0x5a   : > { %1168 = vmatprep.mubr.bf16.mxu1 %v1950_v61 }
  0x60   : > { %1008 = vmatmul.mubr.bf16.gmra.mrb[28].mxu0 %v1952_v62 }
  0x61   : > { %1169 = vmatmul.mubr.bf16.gmra.mrb[28].mxu1 %v1953_v63  ;;  %1015 = vmatprep.mubr.bf16.mxu0 %v1954_v0 }
  0x62   : > { %1176 = vmatprep.mubr.bf16.mxu1 %v1956_v1 }
  0x68   : > { %1016 = vmatmul.mubr.bf16.gmra.mrb[32].mxu0 %v1958_v2 }
  0x69   : > { %1177 = vmatmul.mubr.bf16.gmra.mrb[32].mxu1 %v1959_v3  ;;  %1023 = vmatprep.mubr.bf16.mxu0 %v1960_v4 }
  0x6a   : > { %1184 = vmatprep.mubr.bf16.mxu1 %v1962_v5 }
  0x70   : > { %1024 = vmatmul.mubr.bf16.gmra.mrb[36].mxu0 %v1964_v6 }
  0x71   : > { %1185 = vmatmul.mubr.bf16.gmra.mrb[36].mxu1 %v1965_v7  ;;  %1031 = vmatprep.mubr.bf16.mxu0 %v1966_v8 }
  0x72   : > { %1192 = vmatprep.mubr.bf16.mxu1 %v1968_v9 }
  0x78   : > { %1032 = vmatmul.mubr.bf16.gmra.mrb[40].mxu0 %v1970_v10 }
  0x79   : > { %1193 = vmatmul.mubr.bf16.gmra.mrb[40].mxu1 %v1971_v11  ;;  %1039 = vmatprep.mubr.bf16.mxu0 %v1972_v12 }
  0x7a   : > { %1200 = vmatprep.mubr.bf16.mxu1 %v1974_v13 }
  0x80   : > { %1040 = vmatmul.mubr.bf16.gmra.mrb[44].mxu0 %v1976_v14 }
  0x81   : > { %1201 = vmatmul.mubr.bf16.gmra.mrb[44].mxu1 %v1977_v15  ;;  %1047 = vmatprep.mubr.bf16.mxu0 %v1978_v16 }
  0x82   : > { %1208 = vmatprep.mubr.bf16.mxu1 %v1980_v17 }
  0x88   : > { %1048 = vmatmul.mubr.bf16.gmra.mrb[48].mxu0 %v1982_v18 }
  0x89   : > { %1209 = vmatmul.mubr.bf16.gmra.mrb[48].mxu1 %v1983_v19  ;;  %1055 = vmatprep.mubr.bf16.mxu0 %v1984_v20 }
  0x8a   : > { %1216 = vmatprep.mubr.bf16.mxu1 %v1986_v21 }
  0x90   : > { %1056 = vmatmul.mubr.bf16.gmra.mrb[52].mxu0 %v1988_v22 }
  0x91   : > { %1217 = vmatmul.mubr.bf16.gmra.mrb[52].mxu1 %v1989_v23  ;;  %1063 = vmatprep.mubr.bf16.mxu0 %v1990_v24 }
  0x92   : > { %1224 = vmatprep.mubr.bf16.mxu1 %v1992_v25 }
  0x98   : > { %1064 = vmatmul.mubr.bf16.gmra.mrb[56].mxu0 %v1994_v26 }
  0x99   : > { %1225 = vmatmul.mubr.bf16.gmra.mrb[56].mxu1 %v1995_v27  ;;  %1071 = vmatprep.mubr.bf16.mxu0 %v1996_v28 }
  0x9a   : > { %1232 = vmatprep.mubr.bf16.mxu1 %v1998_v29 }
  0xa0   : > { %1072 = vmatmul.mubr.bf16.gmra.mrb[60].mxu0 %v2000_v30 }
  0xa1   : > { %1233 = vmatmul.mubr.bf16.gmra.mrb[60].mxu1 %v2001_v31 }
  0xfb   : > { %v1642_v32 = vpop.f32.mrb[0].mxu0 }
  0xfc   : > { %v1754_v33 = vpop.f32.mrb[0].mxu1  ;;  %v1643_v34 = vpop.f32.mrb[1].mxu0 }
  0xfd   : > { %v1644_v35 = vadd.f32 %v1643_v34, %v1642_v32  ;;  %v1755_v36 = vpop.f32.mrb[1].mxu1  ;;  %v1645_v37 = vpop.f32.mrb[2].mxu0 }
  0xfe   : > { %v1756_v38 = vadd.f32 %v1755_v36, %v1754_v33  ;;  %v1757_v39 = vpop.f32.mrb[2].mxu1  ;;  %v1646_v40 = vpop.f32.mrb[3].mxu0 }
  0xff   : > { %v1647_v42 = vadd.f32 %v1646_v40, %v1645_v37  ;;  %v1758_v43 = vpop.f32.mrb[3].mxu1 }
 0x100   : > { %v1115_v44 = vadd.f32 %v1756_v38, %v1644_v35  ;;  %v1759_v45 = vadd.f32 %v1758_v43, %v1757_v39 }
 0x102   : > { %v1347_v46 = vadd.f32 %v2236_v41, %v1115_v44  ;;  %v1118_v47 = vadd.f32 %v1759_v45, %v1647_v42 }
 0x103   : > { %v1648_v48 = vpop.f32.mrb[4].mxu0 }
 0x104   : > { %v1348_v49 = vadd.f32 %v2236_v41, %v1118_v47  ;;  %v1760_v50 = vpop.f32.mrb[4].mxu1  ;;  %v1649_v51 = vpop.f32.mrb[5].mxu0  ;;  %v1379_v55 = vmax.f32 %v1347_v46, 0.0 }
 0x105   : > { %v1650_v52 = vadd.f32 %v1649_v51, %v1648_v48  ;;  %v1761_v53 = vpop.f32.mrb[5].mxu1  ;;  %v1651_v54 = vpop.f32.mrb[6].mxu0 }
 0x106   : > { %v1380_v56 = vmax.f32 %v1348_v49, 0.0  ;;  %v1762_v57 = vadd.f32 %v1761_v53, %v1760_v50  ;;  %v1763_v58 = vpop.f32.mrb[6].mxu1  ;;  %v1652_v59 = vpop.f32.mrb[7].mxu0 }
 0x107   : > { %v1653_v60 = vadd.f32 %v1652_v59, %v1651_v54  ;;  %v1764_v61 = vpop.f32.mrb[7].mxu1 }
 0x108   : > { %v1411_v62 = vpack.c.bf16 %v1380_v56, %v1379_v55  ;;  %v1123_v63 = vadd.f32 %v1762_v57, %v1650_v52  ;;  %v1765_v0 = vadd.f32 %v1764_v61, %v1763_v58 }
 0x10a   : > { %1427 = vst [vmem:[%s2243_s21] sm:$0xff] %v1411_v62  ;;  %v1349_v1 = vadd.f32 %v2236_v41, %v1123_v63  ;;  %v1126_v2 = vadd.f32 %v1765_v0, %v1653_v60 }
 0x10b   : > { %v1654_v3 = vpop.f32.mrb[8].mxu0 }
 0x10c   : > { %v1350_v4 = vadd.f32 %v2236_v41, %v1126_v2  ;;  %v1766_v5 = vpop.f32.mrb[8].mxu1  ;;  %v1655_v6 = vpop.f32.mrb[9].mxu0  ;;  %v1381_v10 = vmax.f32 %v1349_v1, 0.0 }
 0x10d   : > { %v1656_v7 = vadd.f32 %v1655_v6, %v1654_v3  ;;  %v1767_v8 = vpop.f32.mrb[9].mxu1  ;;  %v1657_v9 = vpop.f32.mrb[10].mxu0 }
 0x10e   : > { %v1382_v11 = vmax.f32 %v1350_v4, 0.0  ;;  %v1768_v12 = vadd.f32 %v1767_v8, %v1766_v5  ;;  %v1769_v13 = vpop.f32.mrb[10].mxu1  ;;  %v1658_v14 = vpop.f32.mrb[11].mxu0 }
 0x10f   : > { %v1659_v15 = vadd.f32 %v1658_v14, %v1657_v9  ;;  %v1770_v16 = vpop.f32.mrb[11].mxu1 }
 0x110   : > { %v1412_v17 = vpack.c.bf16 %v1382_v11, %v1381_v10  ;;  %v1131_v18 = vadd.f32 %v1768_v12, %v1656_v7  ;;  %v1771_v19 = vadd.f32 %v1770_v16, %v1769_v13 }
 0x112   : > { %1428 = vst [vmem:[%s2243_s21 + $0x8] sm:$0xff] %v1412_v17  ;;  %v1351_v20 = vadd.f32 %v2236_v41, %v1131_v18  ;;  %v1134_v21 = vadd.f32 %v1771_v19, %v1659_v15 }
 0x113   : > { %v1660_v22 = vpop.f32.mrb[12].mxu0 }
 0x114   : > { %v1352_v23 = vadd.f32 %v2236_v41, %v1134_v21  ;;  %v1772_v24 = vpop.f32.mrb[12].mxu1  ;;  %v1661_v25 = vpop.f32.mrb[13].mxu0  ;;  %v1383_v29 = vmax.f32 %v1351_v20, 0.0 }
 0x115   : > { %v1662_v26 = vadd.f32 %v1661_v25, %v1660_v22  ;;  %v1773_v27 = vpop.f32.mrb[13].mxu1  ;;  %v1663_v28 = vpop.f32.mrb[14].mxu0 }
 0x116   : > { %v1384_v30 = vmax.f32 %v1352_v23, 0.0  ;;  %v1774_v31 = vadd.f32 %v1773_v27, %v1772_v24  ;;  %v1775_v32 = vpop.f32.mrb[14].mxu1  ;;  %v1664_v33 = vpop.f32.mrb[15].mxu0 }
 0x117   : > { %v1665_v34 = vadd.f32 %v1664_v33, %v1663_v28  ;;  %v1776_v35 = vpop.f32.mrb[15].mxu1 }
 0x118   : > { %v1413_v36 = vpack.c.bf16 %v1384_v30, %v1383_v29  ;;  %v1139_v37 = vadd.f32 %v1774_v31, %v1662_v26  ;;  %v1777_v38 = vadd.f32 %v1776_v35, %v1775_v32 }
 0x11a   : > { %1429 = vst [vmem:[%s2243_s21 + $0x10] sm:$0xff] %v1413_v36  ;;  %v1353_v39 = vadd.f32 %v2236_v41, %v1139_v37  ;;  %v1142_v40 = vadd.f32 %v1777_v38, %v1665_v34 }
 0x11b   : > { %v1666_v42 = vpop.f32.mrb[16].mxu0 }
 0x11c   : > { %v1354_v43 = vadd.f32 %v2236_v41, %v1142_v40  ;;  %v1778_v44 = vpop.f32.mrb[16].mxu1  ;;  %v1667_v45 = vpop.f32.mrb[17].mxu0  ;;  %v1385_v49 = vmax.f32 %v1353_v39, 0.0 }
 0x11d   : > { %v1668_v46 = vadd.f32 %v1667_v45, %v1666_v42  ;;  %v1779_v47 = vpop.f32.mrb[17].mxu1  ;;  %v1669_v48 = vpop.f32.mrb[18].mxu0 }
 0x11e   : > { %v1386_v50 = vmax.f32 %v1354_v43, 0.0  ;;  %v1780_v51 = vadd.f32 %v1779_v47, %v1778_v44  ;;  %v1781_v52 = vpop.f32.mrb[18].mxu1  ;;  %v1670_v53 = vpop.f32.mrb[19].mxu0 }
 0x11f   : > { %v1671_v54 = vadd.f32 %v1670_v53, %v1669_v48  ;;  %v1782_v55 = vpop.f32.mrb[19].mxu1 }
 0x120   : > { %v1414_v56 = vpack.c.bf16 %v1386_v50, %v1385_v49  ;;  %v1147_v57 = vadd.f32 %v1780_v51, %v1668_v46  ;;  %v1783_v58 = vadd.f32 %v1782_v55, %v1781_v52 }
 0x122   : > { %1430 = vst [vmem:[%s2243_s21 + $0x18] sm:$0xff] %v1414_v56  ;;  %v1355_v59 = vadd.f32 %v2236_v41, %v1147_v57  ;;  %v1150_v60 = vadd.f32 %v1783_v58, %v1671_v54 }
 0x123   : > { %v1672_v61 = vpop.f32.mrb[20].mxu0 }
 0x124   : > { %v1356_v62 = vadd.f32 %v2236_v41, %v1150_v60  ;;  %v1784_v63 = vpop.f32.mrb[20].mxu1  ;;  %v1673_v0 = vpop.f32.mrb[21].mxu0  ;;  %v1387_v4 = vmax.f32 %v1355_v59, 0.0 }
 0x125   : > { %v1674_v1 = vadd.f32 %v1673_v0, %v1672_v61  ;;  %v1785_v2 = vpop.f32.mrb[21].mxu1  ;;  %v1675_v3 = vpop.f32.mrb[22].mxu0 }
 0x126   : > { %v1388_v5 = vmax.f32 %v1356_v62, 0.0  ;;  %v1786_v6 = vadd.f32 %v1785_v2, %v1784_v63  ;;  %v1787_v7 = vpop.f32.mrb[22].mxu1  ;;  %v1676_v8 = vpop.f32.mrb[23].mxu0 }
 0x127   : > { %v1677_v9 = vadd.f32 %v1676_v8, %v1675_v3  ;;  %v1788_v10 = vpop.f32.mrb[23].mxu1 }
 0x128   : > { %v1415_v11 = vpack.c.bf16 %v1388_v5, %v1387_v4  ;;  %v1155_v12 = vadd.f32 %v1786_v6, %v1674_v1  ;;  %v1789_v13 = vadd.f32 %v1788_v10, %v1787_v7 }
 0x12a   : > { %1431 = vst [vmem:[%s2243_s21 + $0x20] sm:$0xff] %v1415_v11  ;;  %v1357_v14 = vadd.f32 %v2236_v41, %v1155_v12  ;;  %v1158_v15 = vadd.f32 %v1789_v13, %v1677_v9 }
 0x12b   : > { %v1678_v16 = vpop.f32.mrb[24].mxu0 }
 0x12c   : > { %v1358_v17 = vadd.f32 %v2236_v41, %v1158_v15  ;;  %v1790_v18 = vpop.f32.mrb[24].mxu1  ;;  %v1679_v19 = vpop.f32.mrb[25].mxu0  ;;  %v1389_v23 = vmax.f32 %v1357_v14, 0.0 }
 0x12d   : > { %v1680_v20 = vadd.f32 %v1679_v19, %v1678_v16  ;;  %v1791_v21 = vpop.f32.mrb[25].mxu1  ;;  %v1681_v22 = vpop.f32.mrb[26].mxu0 }
 0x12e   : > { %v1390_v24 = vmax.f32 %v1358_v17, 0.0  ;;  %v1792_v25 = vadd.f32 %v1791_v21, %v1790_v18  ;;  %v1793_v26 = vpop.f32.mrb[26].mxu1  ;;  %v1682_v27 = vpop.f32.mrb[27].mxu0 }
 0x12f   : > { %v1683_v28 = vadd.f32 %v1682_v27, %v1681_v22  ;;  %v1794_v29 = vpop.f32.mrb[27].mxu1 }
 0x130   : > { %v1416_v30 = vpack.c.bf16 %v1390_v24, %v1389_v23  ;;  %v1163_v31 = vadd.f32 %v1792_v25, %v1680_v20  ;;  %v1795_v32 = vadd.f32 %v1794_v29, %v1793_v26 }
 0x132   : > { %1432 = vst [vmem:[%s2243_s21 + $0x28] sm:$0xff] %v1416_v30  ;;  %v1359_v33 = vadd.f32 %v2236_v41, %v1163_v31  ;;  %v1166_v34 = vadd.f32 %v1795_v32, %v1683_v28 }
 0x133   : > { %v1684_v35 = vpop.f32.mrb[28].mxu0 }
 0x134   : > { %v1360_v36 = vadd.f32 %v2236_v41, %v1166_v34  ;;  %v1796_v37 = vpop.f32.mrb[28].mxu1  ;;  %v1685_v38 = vpop.f32.mrb[29].mxu0  ;;  %v1391_v43 = vmax.f32 %v1359_v33, 0.0 }
 0x135   : > { %v1686_v39 = vadd.f32 %v1685_v38, %v1684_v35  ;;  %v1797_v40 = vpop.f32.mrb[29].mxu1  ;;  %v1687_v42 = vpop.f32.mrb[30].mxu0 }
 0x136   : > { %v1392_v44 = vmax.f32 %v1360_v36, 0.0  ;;  %v1798_v45 = vadd.f32 %v1797_v40, %v1796_v37  ;;  %v1799_v46 = vpop.f32.mrb[30].mxu1  ;;  %v1688_v47 = vpop.f32.mrb[31].mxu0 }
 0x137   : > { %v1689_v48 = vadd.f32 %v1688_v47, %v1687_v42  ;;  %v1800_v49 = vpop.f32.mrb[31].mxu1 }
 0x138   : > { %v1417_v50 = vpack.c.bf16 %v1392_v44, %v1391_v43  ;;  %v1171_v51 = vadd.f32 %v1798_v45, %v1686_v39  ;;  %v1801_v52 = vadd.f32 %v1800_v49, %v1799_v46 }
 0x13a   : > { %1433 = vst [vmem:[%s2243_s21 + $0x30] sm:$0xff] %v1417_v50  ;;  %v1361_v53 = vadd.f32 %v2236_v41, %v1171_v51  ;;  %v1174_v54 = vadd.f32 %v1801_v52, %v1689_v48 }
 0x13b   : > { %v1690_v55 = vpop.f32.mrb[32].mxu0 }
 0x13c   : > { %v1362_v56 = vadd.f32 %v2236_v41, %v1174_v54  ;;  %v1802_v57 = vpop.f32.mrb[32].mxu1  ;;  %v1691_v58 = vpop.f32.mrb[33].mxu0  ;;  %v1393_v62 = vmax.f32 %v1361_v53, 0.0 }
 0x13d   : > { %v1692_v59 = vadd.f32 %v1691_v58, %v1690_v55  ;;  %v1803_v60 = vpop.f32.mrb[33].mxu1  ;;  %v1693_v61 = vpop.f32.mrb[34].mxu0 }
 0x13e   : > { %v1394_v63 = vmax.f32 %v1362_v56, 0.0  ;;  %v1804_v0 = vadd.f32 %v1803_v60, %v1802_v57  ;;  %v1805_v1 = vpop.f32.mrb[34].mxu1  ;;  %v1694_v2 = vpop.f32.mrb[35].mxu0 }
 0x13f   : > { %v1695_v3 = vadd.f32 %v1694_v2, %v1693_v61  ;;  %v1806_v4 = vpop.f32.mrb[35].mxu1 }
 0x140   : > { %v1418_v5 = vpack.c.bf16 %v1394_v63, %v1393_v62  ;;  %v1179_v6 = vadd.f32 %v1804_v0, %v1692_v59  ;;  %v1807_v7 = vadd.f32 %v1806_v4, %v1805_v1 }
 0x142   : > { %1434 = vst [vmem:[%s2243_s21 + $0x38] sm:$0xff] %v1418_v5  ;;  %v1363_v8 = vadd.f32 %v2236_v41, %v1179_v6  ;;  %v1182_v9 = vadd.f32 %v1807_v7, %v1695_v3 }
 0x143   : > { %v1696_v10 = vpop.f32.mrb[36].mxu0 }
 0x144   : > { %v1364_v11 = vadd.f32 %v2236_v41, %v1182_v9  ;;  %v1808_v12 = vpop.f32.mrb[36].mxu1  ;;  %v1697_v13 = vpop.f32.mrb[37].mxu0  ;;  %v1395_v17 = vmax.f32 %v1363_v8, 0.0 }
 0x145   : > { %v1698_v14 = vadd.f32 %v1697_v13, %v1696_v10  ;;  %v1809_v15 = vpop.f32.mrb[37].mxu1  ;;  %v1699_v16 = vpop.f32.mrb[38].mxu0 }
 0x146   : > { %v1396_v18 = vmax.f32 %v1364_v11, 0.0  ;;  %v1810_v19 = vadd.f32 %v1809_v15, %v1808_v12  ;;  %v1811_v20 = vpop.f32.mrb[38].mxu1  ;;  %v1700_v21 = vpop.f32.mrb[39].mxu0 }
 0x147   : > { %v1701_v22 = vadd.f32 %v1700_v21, %v1699_v16  ;;  %v1812_v23 = vpop.f32.mrb[39].mxu1 }
 0x148   : > { %v1419_v24 = vpack.c.bf16 %v1396_v18, %v1395_v17  ;;  %v1187_v25 = vadd.f32 %v1810_v19, %v1698_v14  ;;  %v1813_v26 = vadd.f32 %v1812_v23, %v1811_v20 }
 0x14a   : > { %1435 = vst [vmem:[%s2243_s21 + $0x40] sm:$0xff] %v1419_v24  ;;  %v1365_v27 = vadd.f32 %v2236_v41, %v1187_v25  ;;  %v1190_v28 = vadd.f32 %v1813_v26, %v1701_v22 }
 0x14b   : > { %v1702_v29 = vpop.f32.mrb[40].mxu0 }
 0x14c   : > { %v1366_v30 = vadd.f32 %v2236_v41, %v1190_v28  ;;  %v1814_v31 = vpop.f32.mrb[40].mxu1  ;;  %v1703_v32 = vpop.f32.mrb[41].mxu0  ;;  %v1397_v36 = vmax.f32 %v1365_v27, 0.0 }
 0x14d   : > { %v1704_v33 = vadd.f32 %v1703_v32, %v1702_v29  ;;  %v1815_v34 = vpop.f32.mrb[41].mxu1  ;;  %v1705_v35 = vpop.f32.mrb[42].mxu0 }
 0x14e   : > { %v1398_v37 = vmax.f32 %v1366_v30, 0.0  ;;  %v1816_v38 = vadd.f32 %v1815_v34, %v1814_v31  ;;  %v1817_v39 = vpop.f32.mrb[42].mxu1  ;;  %v1706_v40 = vpop.f32.mrb[43].mxu0 }
 0x14f   : > { %v1707_v42 = vadd.f32 %v1706_v40, %v1705_v35  ;;  %v1818_v43 = vpop.f32.mrb[43].mxu1 }
 0x150   : > { %v1420_v44 = vpack.c.bf16 %v1398_v37, %v1397_v36  ;;  %v1195_v45 = vadd.f32 %v1816_v38, %v1704_v33  ;;  %v1819_v46 = vadd.f32 %v1818_v43, %v1817_v39 }
 0x152   : > { %1436 = vst [vmem:[%s2243_s21 + $0x48] sm:$0xff] %v1420_v44  ;;  %v1367_v47 = vadd.f32 %v2236_v41, %v1195_v45  ;;  %v1198_v48 = vadd.f32 %v1819_v46, %v1707_v42 }
 0x153   : > { %v1708_v49 = vpop.f32.mrb[44].mxu0 }
 0x154   : > { %v1368_v50 = vadd.f32 %v2236_v41, %v1198_v48  ;;  %v1820_v51 = vpop.f32.mrb[44].mxu1  ;;  %v1709_v52 = vpop.f32.mrb[45].mxu0  ;;  %v1399_v56 = vmax.f32 %v1367_v47, 0.0 }
 0x155   : > { %v1710_v53 = vadd.f32 %v1709_v52, %v1708_v49  ;;  %v1821_v54 = vpop.f32.mrb[45].mxu1  ;;  %v1711_v55 = vpop.f32.mrb[46].mxu0 }
 0x156   : > { %v1400_v57 = vmax.f32 %v1368_v50, 0.0  ;;  %v1822_v58 = vadd.f32 %v1821_v54, %v1820_v51  ;;  %v1823_v59 = vpop.f32.mrb[46].mxu1  ;;  %v1712_v60 = vpop.f32.mrb[47].mxu0 }
 0x157   : > { %v1713_v61 = vadd.f32 %v1712_v60, %v1711_v55  ;;  %v1824_v62 = vpop.f32.mrb[47].mxu1 }
 0x158   : > { %v1421_v63 = vpack.c.bf16 %v1400_v57, %v1399_v56  ;;  %v1203_v0 = vadd.f32 %v1822_v58, %v1710_v53  ;;  %v1825_v1 = vadd.f32 %v1824_v62, %v1823_v59 }
 0x15a   : > { %1437 = vst [vmem:[%s2243_s21 + $0x50] sm:$0xff] %v1421_v63  ;;  %v1369_v2 = vadd.f32 %v2236_v41, %v1203_v0  ;;  %v1206_v3 = vadd.f32 %v1825_v1, %v1713_v61 }
 0x15b   : > { %v1714_v4 = vpop.f32.mrb[48].mxu0 }
 0x15c   : > { %v1370_v5 = vadd.f32 %v2236_v41, %v1206_v3  ;;  %v1826_v6 = vpop.f32.mrb[48].mxu1  ;;  %v1715_v7 = vpop.f32.mrb[49].mxu0  ;;  %v1401_v11 = vmax.f32 %v1369_v2, 0.0 }
 0x15d   : > { %v1716_v8 = vadd.f32 %v1715_v7, %v1714_v4  ;;  %v1827_v9 = vpop.f32.mrb[49].mxu1  ;;  %v1717_v10 = vpop.f32.mrb[50].mxu0 }
 0x15e   : > { %v1402_v12 = vmax.f32 %v1370_v5, 0.0  ;;  %v1828_v13 = vadd.f32 %v1827_v9, %v1826_v6  ;;  %v1829_v14 = vpop.f32.mrb[50].mxu1  ;;  %v1718_v15 = vpop.f32.mrb[51].mxu0 }
 0x15f   : > { %v1719_v16 = vadd.f32 %v1718_v15, %v1717_v10  ;;  %v1830_v17 = vpop.f32.mrb[51].mxu1 }
 0x160   : > { %v1422_v18 = vpack.c.bf16 %v1402_v12, %v1401_v11  ;;  %v1211_v19 = vadd.f32 %v1828_v13, %v1716_v8  ;;  %v1831_v20 = vadd.f32 %v1830_v17, %v1829_v14 }
 0x162   : > { %1438 = vst [vmem:[%s2243_s21 + $0x58] sm:$0xff] %v1422_v18  ;;  %v1371_v21 = vadd.f32 %v2236_v41, %v1211_v19  ;;  %v1214_v22 = vadd.f32 %v1831_v20, %v1719_v16 }
 0x163   : > { %v1720_v23 = vpop.f32.mrb[52].mxu0 }
 0x164   : > { %v1372_v24 = vadd.f32 %v2236_v41, %v1214_v22  ;;  %v1832_v25 = vpop.f32.mrb[52].mxu1  ;;  %v1721_v26 = vpop.f32.mrb[53].mxu0  ;;  %v1403_v30 = vmax.f32 %v1371_v21, 0.0 }
 0x165   : > { %v1722_v27 = vadd.f32 %v1721_v26, %v1720_v23  ;;  %v1833_v28 = vpop.f32.mrb[53].mxu1  ;;  %v1723_v29 = vpop.f32.mrb[54].mxu0 }
 0x166   : > { %v1404_v31 = vmax.f32 %v1372_v24, 0.0  ;;  %v1834_v32 = vadd.f32 %v1833_v28, %v1832_v25  ;;  %v1835_v33 = vpop.f32.mrb[54].mxu1  ;;  %v1724_v34 = vpop.f32.mrb[55].mxu0 }
 0x167   : > { %v1725_v35 = vadd.f32 %v1724_v34, %v1723_v29  ;;  %v1836_v36 = vpop.f32.mrb[55].mxu1 }
 0x168   : > { %v1423_v37 = vpack.c.bf16 %v1404_v31, %v1403_v30  ;;  %v1219_v38 = vadd.f32 %v1834_v32, %v1722_v27  ;;  %v1837_v39 = vadd.f32 %v1836_v36, %v1835_v33 }
 0x16a   : > { %1439 = vst [vmem:[%s2243_s21 + $0x60] sm:$0xff] %v1423_v37  ;;  %v1373_v40 = vadd.f32 %v2236_v41, %v1219_v38  ;;  %v1222_v42 = vadd.f32 %v1837_v39, %v1725_v35 }
 0x16b   : > { %v1726_v43 = vpop.f32.mrb[56].mxu0 }
 0x16c   : > { %v1374_v44 = vadd.f32 %v2236_v41, %v1222_v42  ;;  %v1838_v45 = vpop.f32.mrb[56].mxu1  ;;  %v1727_v46 = vpop.f32.mrb[57].mxu0  ;;  %v1405_v50 = vmax.f32 %v1373_v40, 0.0 }
 0x16d   : > { %v1728_v47 = vadd.f32 %v1727_v46, %v1726_v43  ;;  %v1839_v48 = vpop.f32.mrb[57].mxu1  ;;  %v1729_v49 = vpop.f32.mrb[58].mxu0 }
 0x16e   : > { %v1406_v51 = vmax.f32 %v1374_v44, 0.0  ;;  %v1840_v52 = vadd.f32 %v1839_v48, %v1838_v45  ;;  %v1841_v53 = vpop.f32.mrb[58].mxu1  ;;  %v1730_v54 = vpop.f32.mrb[59].mxu0 }
 0x16f   : > { %v1731_v55 = vadd.f32 %v1730_v54, %v1729_v49  ;;  %v1842_v56 = vpop.f32.mrb[59].mxu1 }
 0x170   : > { %v1424_v57 = vpack.c.bf16 %v1406_v51, %v1405_v50  ;;  %v1227_v58 = vadd.f32 %v1840_v52, %v1728_v47  ;;  %v1843_v59 = vadd.f32 %v1842_v56, %v1841_v53 }
 0x172   : > { %1440 = vst [vmem:[%s2243_s21 + $0x68] sm:$0xff] %v1424_v57  ;;  %v1375_v60 = vadd.f32 %v2236_v41, %v1227_v58  ;;  %v1230_v61 = vadd.f32 %v1843_v59, %v1731_v55 }
 0x173   : > { %v1732_v62 = vpop.f32.mrb[60].mxu0 }
 0x174   : > { %v1376_v63 = vadd.f32 %v2236_v41, %v1230_v61  ;;  %v1844_v0 = vpop.f32.mrb[60].mxu1  ;;  %v1733_v1 = vpop.f32.mrb[61].mxu0  ;;  %v1407_v5 = vmax.f32 %v1375_v60, 0.0 }
 0x175   : > { %v1734_v2 = vadd.f32 %v1733_v1, %v1732_v62  ;;  %v1845_v3 = vpop.f32.mrb[61].mxu1  ;;  %v1735_v4 = vpop.f32.mrb[62].mxu0 }
 0x176   : > { %v1408_v6 = vmax.f32 %v1376_v63, 0.0  ;;  %v1846_v7 = vadd.f32 %v1845_v3, %v1844_v0  ;;  %v1847_v8 = vpop.f32.mrb[62].mxu1  ;;  %v1736_v9 = vpop.f32.mrb[63].mxu0 }
 0x177   : > { %v1737_v10 = vadd.f32 %v1736_v9, %v1735_v4  ;;  %v1848_v11 = vpop.f32.mrb[63].mxu1 }
 0x178   : > { %v1425_v12 = vpack.c.bf16 %v1408_v6, %v1407_v5  ;;  %v1235_v13 = vadd.f32 %v1846_v7, %v1734_v2  ;;  %v1849_v14 = vadd.f32 %v1848_v11, %v1847_v8 }
 0x17a   : > { %1441 = vst [vmem:[%s2243_s21 + $0x70] sm:$0xff] %v1425_v12  ;;  %v1377_v15 = vadd.f32 %v2236_v41, %v1235_v13  ;;  %v1238_v16 = vadd.f32 %v1849_v14, %v1737_v10 }
 0x17c   : > { %v1378_v17 = vadd.f32 %v2236_v41, %v1238_v16  ;;  %v1409_v18 = vmax.f32 %v1377_v15, 0.0 }
 0x17e   : > { %v1410_v19 = vmax.f32 %v1378_v17, 0.0 }
 0x180   : > { %v1426_v20 = vpack.c.bf16 %v1410_v19, %v1409_v18 }
 0x182   : > { %1442 = vst [vmem:[%s2243_s21 + $0x78] sm:$0xff] %v1426_v20 }
 0x183 PF: > { %s13_s14 = sadd.s32 1, %s2024_s14   ;;  %s2304_s12 = smov %s2020_s13 }
 0x184   : > { %p10_p6 = scmp.ge.s32.totalorder %s13_s14, 4   ;;  %s2305_s13 = smov %s2307_s15 }
 0x186   :  { %12 = sbr.rel (!%p10_p6) target bundleno = 2 (0x2), region = 71 }

// kernel: net_forward.3
= control target key start
LH: loop header
LB: loop body
LE: loop exit
PB: predicated region body
PF: predicated region fallthrough
CT: control target
= control target key end

     0   :  { %s2014_s12 = smov 0   ;;  %s2016_s13 = smov 0   ;;  %s2287_s0 = inlined_call_operand.vmem [shape: bf16[512,512], index: 0, kind: input, shape index: {}]   ;;  %s2288_s1 = inlined_call_operand.vmem [shape: bf16[512,128], index: 1, kind: input, shape index: {}]   ;;  %s2289_s2 = inlined_call_operand.vmem [shape: f32[1,128], index: 2, kind: input, shape index: {}]   ;;  %s2290_s3 = inlined_call_operand.vmem [shape: f32[512,128], index: 3, kind: output, shape index: {}]  }
   0x1   :  { %s2018_s14 = smov 0  }
   0x2 LB: > { %s25_s15 = sadd.s32 1, %s1988_s13  ;;  %p1488_p0 = scmp.ge.s32.totalorder %s1992_s14, 1  ;;  %s1992_s14 = sphi %s2018_s14, %s13_s14   ;;  %s1988_s13 = sphi %s2016_s13, %s2292_s13   ;;  %s1984_s12 = sphi %s2014_s12, %s2291_s12  }
   0x3   : > { %p27_p1 = scmp.ge.s32.totalorder %s25_s15, 2  ;;  %p158_p2 = scmp.lt.s32.totalorder %s1992_s14, 3 }
   0x5   : > { %s2294_s15 = smov (%p27_p1, %s25_s15), 0  ;;  %p159_p3 = pnand %p1488_p0, %p158_p2 }
   0x6   : > { %v1842_v0 = vld [vmem:[%s2288_s1 + $0x40] sm:$0xff] (!%p159_p3)   ;;  %v1846_v4 = vld [vmem:[%s2288_s1 + $0x48] sm:$0xff] (!%p159_p3)   ;;  %v1850_v8 = vld [vmem:[%s2288_s1 + $0x50] sm:$0xff] (!%p159_p3)   ;;  %s1489_s25 = sshll.u32 (!%p159_p3), %s1984_s12, 5 }
   0x7   : > { %162 = sbr.rel (%p159_p3) target bundleno = 383 (0x17f), region = 32  ;;  %v1843_v1 = vld [vmem:[%s2288_s1 + $0xc0] sm:$0xff] (!%p159_p3)   ;;  %1594 = vmatprep.subr.bf16.mxu0 (!%p159_p3), %v1842_v0  ;;  %v1847_v5 = vld [vmem:[%s2288_s1 + $0xc8] sm:$0xff] (!%p159_p3)   ;;  %v1851_v9 = vld [vmem:[%s2288_s1 + $0xd0] sm:$0xff] (!%p159_p3)   ;;  %p189_p4 = scmp.lt.s32.totalorder (!%p159_p3), %s1489_s25, 63 }
   0x8   : > { %v1844_v2 = vld [vmem:[%s2288_s1] sm:$0xff] (!%p159_p3)   ;;  %1706 = vmatprep.subr.bf16.mxu1 (!%p159_p3), %v1843_v1  ;;  %v1848_v6 = vld [vmem:[%s2288_s1 + $0x8] sm:$0xff] (!%p159_p3)   ;;  %v1852_v10 = vld [vmem:[%s2288_s1 + $0x10] sm:$0xff] (!%p159_p3)  }
   0x9   : > { %v1845_v3 = vld [vmem:[%s2288_s1 + $0x80] sm:$0xff] (!%p159_p3)   ;;  %1595 = vmatpush3.bf16.msra.mxu0 (!%p159_p3), %v1844_v2  ;;  %v1849_v7 = vld [vmem:[%s2288_s1 + $0x88] sm:$0xff] (!%p159_p3)   ;;  %v1853_v11 = vld [vmem:[%s2288_s1 + $0x90] sm:$0xff] (!%p159_p3)  }
   0xa   : > { %1707 = vmatpush3.bf16.msra.mxu1 (!%p159_p3), %v1845_v3  ;;  %1596 = vmatprep.subr.bf16.mxu0 (!%p159_p3), %v1846_v4  ;;  %v1854_v12 = vld [vmem:[%s2288_s1 + $0x58] sm:$0xff] (!%p159_p3)   ;;  %v1858_v16 = vld [vmem:[%s2288_s1 + $0x60] sm:$0xff] (!%p159_p3)   ;;  %v1862_v20 = vld [vmem:[%s2288_s1 + $0x68] sm:$0xff] (!%p159_p3)  }
   0xb   : > { %1708 = vmatprep.subr.bf16.mxu1 (!%p159_p3), %v1847_v5  ;;  %v1855_v13 = vld [vmem:[%s2288_s1 + $0xd8] sm:$0xff] (!%p159_p3)   ;;  %v1859_v17 = vld [vmem:[%s2288_s1 + $0xe0] sm:$0xff] (!%p159_p3)   ;;  %v1863_v21 = vld [vmem:[%s2288_s1 + $0xe8] sm:$0xff] (!%p159_p3)  }
   0xc   : > { %v1856_v14 = vld [vmem:[%s2288_s1 + $0x18] sm:$0xff] (!%p159_p3)   ;;  %v1860_v18 = vld [vmem:[%s2288_s1 + $0x20] sm:$0xff] (!%p159_p3)   ;;  %v1864_v22 = vld [vmem:[%s2288_s1 + $0x28] sm:$0xff] (!%p159_p3)  }
   0xd   : > { %1597 = vmatpush3.bf16.msra.mxu0 (!%p159_p3), %v1848_v6  ;;  %v1857_v15 = vld [vmem:[%s2288_s1 + $0x98] sm:$0xff] (!%p159_p3)   ;;  %v1861_v19 = vld [vmem:[%s2288_s1 + $0xa0] sm:$0xff] (!%p159_p3)   ;;  %v1865_v23 = vld [vmem:[%s2288_s1 + $0xa8] sm:$0xff] (!%p159_p3)  }
   0xe   : > { %1709 = vmatpush3.bf16.msra.mxu1 %v1849_v7  ;;  %1598 = vmatprep.subr.bf16.mxu0 %v1850_v8  ;;  %s2296_s25 = smov (!%p189_p4, %s1489_s25), 63  ;;  %v1866_v24 = vld [vmem:[%s2288_s1 + $0x70] sm:$0xff]   ;;  %v1870_v28 = vld [vmem:[%s2288_s1 + $0x78] sm:$0xff]  }
   0xf   : > { %1710 = vmatprep.subr.bf16.mxu1 %v1851_v9  ;;  %v1867_v25 = vld [vmem:[%s2288_s1 + $0xf0] sm:$0xff]   ;;  %s1593_s24 = sshll.u32 %s2296_s25, 4  ;;  %v1871_v29 = vld [vmem:[%s2288_s1 + $0xf8] sm:$0xff]   ;;  %s1493_s11 = sshll.u32 %s2296_s25, 3 }
  0x10   : > { %v1868_v26 = vld [vmem:[%s2288_s1 + $0x30] sm:$0xff]   ;;  %s2131_s12 = scalar_lea.vmem %s2287_s0, %s1593_s24  ;;  %v1872_v30 = vld [vmem:[%s2288_s1 + $0x38] sm:$0xff]   ;;  %s2212_s20 = scalar_lea.vmem %s2290_s3, %s1493_s11 }
  0x11   : > { %1599 = vmatpush3.bf16.msra.mxu0 %v1852_v10  ;;  %v1869_v27 = vld [vmem:[%s2288_s1 + $0xb0] sm:$0xff]   ;;  %v1873_v31 = vld [vmem:[%s2288_s1 + $0xb8] sm:$0xff]  }
  0x12   : > { %1711 = vmatpush3.bf16.msra.mxu1 %v1853_v11  ;;  %1600 = vmatprep.subr.bf16.mxu0 %v1854_v12  ;;  %v1874_v32 = vld [vmem:[%s2131_s12] ss:$16 sps:$4 sm:$0xff]   ;;  %v1876_v33 = vld [vmem:[%s2131_s12 + $0x4] ss:$16 sps:$4 sm:$0xff]   ;;  %v1877_v34 = vld [vmem:[%s2131_s12 + $0x8] ss:$16 sps:$4 sm:$0xff]  }
  0x13   : > { %1712 = vmatprep.subr.bf16.mxu1 %v1855_v13  ;;  %v1879_v35 = vld [vmem:[%s2131_s12 + $0xc] ss:$16 sps:$4 sm:$0xff]   ;;  %951 = vmatprep.mubr.bf16.mxu0 %v1876_v33  ;;  %v1880_v36 = vld [vmem:[%s2131_s12 + $0x24] ss:$16 sps:$4 sm:$0xff]   ;;  %v1884_v38 = vld [vmem:[%s2131_s12 + $0x20] ss:$16 sps:$4 sm:$0xff]  }
  0x14   : > { %1112 = vmatprep.mubr.bf16.mxu1 %v1879_v35  ;;  %v1882_v37 = vld [vmem:[%s2131_s12 + $0x2c] ss:$16 sps:$4 sm:$0xff]   ;;  %v1885_v39 = vld [vmem:[%s2131_s12 + $0x28] ss:$16 sps:$4 sm:$0xff]   ;;  %v1886_v40 = vld [vmem:[%s2131_s12 + $0x44] ss:$16 sps:$4 sm:$0xff]  }
  0x15   : > { %1601 = vmatpush3.bf16.msra.mxu0 %v1856_v14  ;;  %v1888_v41 = vld [vmem:[%s2131_s12 + $0x4c] ss:$16 sps:$4 sm:$0xff]   ;;  %v1890_v42 = vld [vmem:[%s2131_s12 + $0x40] ss:$16 sps:$4 sm:$0xff]   ;;  %v1891_v43 = vld [vmem:[%s2131_s12 + $0x48] ss:$16 sps:$4 sm:$0xff]  }
  0x16   : > { %1713 = vmatpush3.bf16.msra.mxu1 %v1857_v15  ;;  %1602 = vmatprep.subr.bf16.mxu0 %v1858_v16  ;;  %v1892_v44 = vld [vmem:[%s2131_s12 + $0x64] ss:$16 sps:$4 sm:$0xff]   ;;  %v1894_v45 = vld [vmem:[%s2131_s12 + $0x6c] ss:$16 sps:$4 sm:$0xff]   ;;  %v1896_v46 = vld [vmem:[%s2131_s12 + $0x60] ss:$16 sps:$4 sm:$0xff]  }
  0x17   : > { %1714 = vmatprep.subr.bf16.mxu1 %v1859_v17  ;;  %v1897_v47 = vld [vmem:[%s2131_s12 + $0x68] ss:$16 sps:$4 sm:$0xff]   ;;  %v1898_v48 = vld [vmem:[%s2131_s12 + $0x84] ss:$16 sps:$4 sm:$0xff]   ;;  %v1900_v49 = vld [vmem:[%s2131_s12 + $0x8c] ss:$16 sps:$4 sm:$0xff]  }
  0x18   : > { %v1902_v50 = vld [vmem:[%s2131_s12 + $0x80] ss:$16 sps:$4 sm:$0xff]   ;;  %v1903_v51 = vld [vmem:[%s2131_s12 + $0x88] ss:$16 sps:$4 sm:$0xff]   ;;  %v1904_v52 = vld [vmem:[%s2131_s12 + $0xa4] ss:$16 sps:$4 sm:$0xff]  }
  0x19   : > { %1603 = vmatpush3.bf16.msra.mxu0 %v1860_v18  ;;  %v1906_v53 = vld [vmem:[%s2131_s12 + $0xac] ss:$16 sps:$4 sm:$0xff]   ;;  %v1908_v54 = vld [vmem:[%s2131_s12 + $0xa0] ss:$16 sps:$4 sm:$0xff]   ;;  %v1909_v55 = vld [vmem:[%s2131_s12 + $0xa8] ss:$16 sps:$4 sm:$0xff]  }
  0x1a   : > { %1715 = vmatpush3.bf16.msra.mxu1 %v1861_v19  ;;  %1604 = vmatprep.subr.bf16.mxu0 %v1862_v20  ;;  %v1910_v56 = vld [vmem:[%s2131_s12 + $0xc4] ss:$16 sps:$4 sm:$0xff]   ;;  %v1912_v57 = vld [vmem:[%s2131_s12 + $0xcc] ss:$16 sps:$4 sm:$0xff]   ;;  %v1914_v58 = vld [vmem:[%s2131_s12 + $0xc0] ss:$16 sps:$4 sm:$0xff]  }
  0x1b   : > { %1716 = vmatprep.subr.bf16.mxu1 %v1863_v21  ;;  %v1915_v59 = vld [vmem:[%s2131_s12 + $0xc8] ss:$16 sps:$4 sm:$0xff]   ;;  %v1916_v60 = vld [vmem:[%s2131_s12 + $0xe4] ss:$16 sps:$4 sm:$0xff]   ;;  %v1918_v61 = vld [vmem:[%s2131_s12 + $0xec] ss:$16 sps:$4 sm:$0xff]  }
  0x1c   : > { %v1920_v62 = vld [vmem:[%s2131_s12 + $0xe0] ss:$16 sps:$4 sm:$0xff]   ;;  %v1921_v63 = vld [vmem:[%s2131_s12 + $0xe8] ss:$16 sps:$4 sm:$0xff]   ;;  %v1922_v0 = vld [vmem:[%s2131_s12 + $0x104] ss:$16 sps:$4 sm:$0xff]  }
  0x1d   : > { %1605 = vmatpush3.bf16.msra.mxu0 %v1864_v22  ;;  %v1924_v1 = vld [vmem:[%s2131_s12 + $0x10c] ss:$16 sps:$4 sm:$0xff]   ;;  %v1926_v2 = vld [vmem:[%s2131_s12 + $0x100] ss:$16 sps:$4 sm:$0xff]   ;;  %v1927_v3 = vld [vmem:[%s2131_s12 + $0x108] ss:$16 sps:$4 sm:$0xff]  }
  0x1e   : > { %1717 = vmatpush3.bf16.msra.mxu1 %v1865_v23  ;;  %1606 = vmatprep.subr.bf16.mxu0 %v1866_v24  ;;  %v1928_v4 = vld [vmem:[%s2131_s12 + $0x124] ss:$16 sps:$4 sm:$0xff]   ;;  %v1930_v5 = vld [vmem:[%s2131_s12 + $0x12c] ss:$16 sps:$4 sm:$0xff]   ;;  %v1932_v6 = vld [vmem:[%s2131_s12 + $0x120] ss:$16 sps:$4 sm:$0xff]  }
  0x1f   : > { %1718 = vmatprep.subr.bf16.mxu1 %v1867_v25  ;;  %v1933_v7 = vld [vmem:[%s2131_s12 + $0x128] ss:$16 sps:$4 sm:$0xff]   ;;  %v1934_v8 = vld [vmem:[%s2131_s12 + $0x144] ss:$16 sps:$4 sm:$0xff]   ;;  %v1936_v9 = vld [vmem:[%s2131_s12 + $0x14c] ss:$16 sps:$4 sm:$0xff]  }
  0x20   : > { %v1938_v10 = vld [vmem:[%s2131_s12 + $0x140] ss:$16 sps:$4 sm:$0xff]   ;;  %v1939_v11 = vld [vmem:[%s2131_s12 + $0x148] ss:$16 sps:$4 sm:$0xff]   ;;  %v1940_v12 = vld [vmem:[%s2131_s12 + $0x164] ss:$16 sps:$4 sm:$0xff]  }
  0x21   : > { %1607 = vmatpush3.bf16.msra.mxu0 %v1868_v26  ;;  %v1942_v13 = vld [vmem:[%s2131_s12 + $0x16c] ss:$16 sps:$4 sm:$0xff]   ;;  %v1944_v14 = vld [vmem:[%s2131_s12 + $0x160] ss:$16 sps:$4 sm:$0xff]   ;;  %v1945_v15 = vld [vmem:[%s2131_s12 + $0x168] ss:$16 sps:$4 sm:$0xff]  }
  0x22   : > { %1719 = vmatpush3.bf16.msra.mxu1 %v1869_v27  ;;  %1608 = vmatprep.subr.bf16.mxu0 %v1870_v28  ;;  %v1946_v16 = vld [vmem:[%s2131_s12 + $0x184] ss:$16 sps:$4 sm:$0xff]   ;;  %v1948_v17 = vld [vmem:[%s2131_s12 + $0x18c] ss:$16 sps:$4 sm:$0xff]   ;;  %v1950_v18 = vld [vmem:[%s2131_s12 + $0x180] ss:$16 sps:$4 sm:$0xff]  }
  0x23   : > { %1720 = vmatprep.subr.bf16.mxu1 %v1871_v29  ;;  %v1951_v19 = vld [vmem:[%s2131_s12 + $0x188] ss:$16 sps:$4 sm:$0xff]   ;;  %v1952_v20 = vld [vmem:[%s2131_s12 + $0x1a4] ss:$16 sps:$4 sm:$0xff]   ;;  %v1954_v21 = vld [vmem:[%s2131_s12 + $0x1ac] ss:$16 sps:$4 sm:$0xff]  }
  0x24   : > { %v1956_v22 = vld [vmem:[%s2131_s12 + $0x1a0] ss:$16 sps:$4 sm:$0xff]   ;;  %v1957_v23 = vld [vmem:[%s2131_s12 + $0x1a8] ss:$16 sps:$4 sm:$0xff]   ;;  %v1958_v24 = vld [vmem:[%s2131_s12 + $0x1c4] ss:$16 sps:$4 sm:$0xff]  }
  0x25   : > { %1609 = vmatpush3.bf16.msra.mxu0 %v1872_v30  ;;  %v1960_v25 = vld [vmem:[%s2131_s12 + $0x1cc] ss:$16 sps:$4 sm:$0xff]   ;;  %v1962_v26 = vld [vmem:[%s2131_s12 + $0x1c0] ss:$16 sps:$4 sm:$0xff]   ;;  %v1963_v27 = vld [vmem:[%s2131_s12 + $0x1c8] ss:$16 sps:$4 sm:$0xff]  }
  0x26   : > { %1721 = vmatpush3.bf16.msra.mxu1 %v1873_v31  ;;  %v1964_v28 = vld [vmem:[%s2131_s12 + $0x1e4] ss:$16 sps:$4 sm:$0xff]   ;;  %v1966_v29 = vld [vmem:[%s2131_s12 + $0x1ec] ss:$16 sps:$4 sm:$0xff]   ;;  %v1968_v30 = vld [vmem:[%s2131_s12 + $0x1e0] ss:$16 sps:$4 sm:$0xff]  }
  0x27   : > { %v1969_v31 = vld [vmem:[%s2131_s12 + $0x1e8] ss:$16 sps:$4 sm:$0xff]  }
  0x28   : > { %952 = vmatmul.mubr.bf16.vlgmr.msra.gmra.mrb[0].mxu0 %v1874_v32 }
  0x29   : > { %1113 = vmatmul.mubr.bf16.vlgmr.msra.gmra.mrb[0].mxu1 %v1877_v34  ;;  %959 = vmatprep.mubr.bf16.mxu0 %v1880_v36 }
  0x2a   : > { %1120 = vmatprep.mubr.bf16.mxu1 %v1882_v37 }
  0x30   : > { %960 = vmatmul.mubr.bf16.gmra.mrb[4].mxu0 %v1884_v38 }
  0x31   : > { %1121 = vmatmul.mubr.bf16.gmra.mrb[4].mxu1 %v1885_v39  ;;  %967 = vmatprep.mubr.bf16.mxu0 %v1886_v40 }
  0x32   : > { %1128 = vmatprep.mubr.bf16.mxu1 %v1888_v41  ;;  %v2207_v41 = vld [vmem:[%s2289_s2] ss:$0 sm:$0xff] }
  0x38   : > { %968 = vmatmul.mubr.bf16.gmra.mrb[8].mxu0 %v1890_v42 }
  0x39   : > { %1129 = vmatmul.mubr.bf16.gmra.mrb[8].mxu1 %v1891_v43  ;;  %975 = vmatprep.mubr.bf16.mxu0 %v1892_v44 }
  0x3a   : > { %1136 = vmatprep.mubr.bf16.mxu1 %v1894_v45 }
  0x40   : > { %976 = vmatmul.mubr.bf16.gmra.mrb[12].mxu0 %v1896_v46 }
  0x41   : > { %1137 = vmatmul.mubr.bf16.gmra.mrb[12].mxu1 %v1897_v47  ;;  %983 = vmatprep.mubr.bf16.mxu0 %v1898_v48 }
  0x42   : > { %1144 = vmatprep.mubr.bf16.mxu1 %v1900_v49 }
  0x48   : > { %984 = vmatmul.mubr.bf16.gmra.mrb[16].mxu0 %v1902_v50 }
  0x49   : > { %1145 = vmatmul.mubr.bf16.gmra.mrb[16].mxu1 %v1903_v51  ;;  %991 = vmatprep.mubr.bf16.mxu0 %v1904_v52 }
  0x4a   : > { %1152 = vmatprep.mubr.bf16.mxu1 %v1906_v53 }
  0x50   : > { %992 = vmatmul.mubr.bf16.gmra.mrb[20].mxu0 %v1908_v54 }
  0x51   : > { %1153 = vmatmul.mubr.bf16.gmra.mrb[20].mxu1 %v1909_v55  ;;  %999 = vmatprep.mubr.bf16.mxu0 %v1910_v56 }
  0x52   : > { %1160 = vmatprep.mubr.bf16.mxu1 %v1912_v57 }
  0x58   : > { %1000 = vmatmul.mubr.bf16.gmra.mrb[24].mxu0 %v1914_v58 }
  0x59   : > { %1161 = vmatmul.mubr.bf16.gmra.mrb[24].mxu1 %v1915_v59  ;;  %1007 = vmatprep.mubr.bf16.mxu0 %v1916_v60 }
  0x5a   : > { %1168 = vmatprep.mubr.bf16.mxu1 %v1918_v61 }
  0x60   : > { %1008 = vmatmul.mubr.bf16.gmra.mrb[28].mxu0 %v1920_v62 }
  0x61   : > { %1169 = vmatmul.mubr.bf16.gmra.mrb[28].mxu1 %v1921_v63  ;;  %1015 = vmatprep.mubr.bf16.mxu0 %v1922_v0 }
  0x62   : > { %1176 = vmatprep.mubr.bf16.mxu1 %v1924_v1 }
  0x68   : > { %1016 = vmatmul.mubr.bf16.gmra.mrb[32].mxu0 %v1926_v2 }
  0x69   : > { %1177 = vmatmul.mubr.bf16.gmra.mrb[32].mxu1 %v1927_v3  ;;  %1023 = vmatprep.mubr.bf16.mxu0 %v1928_v4 }
  0x6a   : > { %1184 = vmatprep.mubr.bf16.mxu1 %v1930_v5 }
  0x70   : > { %1024 = vmatmul.mubr.bf16.gmra.mrb[36].mxu0 %v1932_v6 }
  0x71   : > { %1185 = vmatmul.mubr.bf16.gmra.mrb[36].mxu1 %v1933_v7  ;;  %1031 = vmatprep.mubr.bf16.mxu0 %v1934_v8 }
  0x72   : > { %1192 = vmatprep.mubr.bf16.mxu1 %v1936_v9 }
  0x78   : > { %1032 = vmatmul.mubr.bf16.gmra.mrb[40].mxu0 %v1938_v10 }
  0x79   : > { %1193 = vmatmul.mubr.bf16.gmra.mrb[40].mxu1 %v1939_v11  ;;  %1039 = vmatprep.mubr.bf16.mxu0 %v1940_v12 }
  0x7a   : > { %1200 = vmatprep.mubr.bf16.mxu1 %v1942_v13 }
  0x80   : > { %1040 = vmatmul.mubr.bf16.gmra.mrb[44].mxu0 %v1944_v14 }
  0x81   : > { %1201 = vmatmul.mubr.bf16.gmra.mrb[44].mxu1 %v1945_v15  ;;  %1047 = vmatprep.mubr.bf16.mxu0 %v1946_v16 }
  0x82   : > { %1208 = vmatprep.mubr.bf16.mxu1 %v1948_v17 }
  0x88   : > { %1048 = vmatmul.mubr.bf16.gmra.mrb[48].mxu0 %v1950_v18 }
  0x89   : > { %1209 = vmatmul.mubr.bf16.gmra.mrb[48].mxu1 %v1951_v19  ;;  %1055 = vmatprep.mubr.bf16.mxu0 %v1952_v20 }
  0x8a   : > { %1216 = vmatprep.mubr.bf16.mxu1 %v1954_v21 }
  0x90   : > { %1056 = vmatmul.mubr.bf16.gmra.mrb[52].mxu0 %v1956_v22 }
  0x91   : > { %1217 = vmatmul.mubr.bf16.gmra.mrb[52].mxu1 %v1957_v23  ;;  %1063 = vmatprep.mubr.bf16.mxu0 %v1958_v24 }
  0x92   : > { %1224 = vmatprep.mubr.bf16.mxu1 %v1960_v25 }
  0x98   : > { %1064 = vmatmul.mubr.bf16.gmra.mrb[56].mxu0 %v1962_v26 }
  0x99   : > { %1225 = vmatmul.mubr.bf16.gmra.mrb[56].mxu1 %v1963_v27  ;;  %1071 = vmatprep.mubr.bf16.mxu0 %v1964_v28 }
  0x9a   : > { %1232 = vmatprep.mubr.bf16.mxu1 %v1966_v29 }
  0xa0   : > { %1072 = vmatmul.mubr.bf16.gmra.mrb[60].mxu0 %v1968_v30 }
  0xa1   : > { %1233 = vmatmul.mubr.bf16.gmra.mrb[60].mxu1 %v1969_v31 }
  0xfb   : > { %v1610_v32 = vpop.f32.mrb[0].mxu0 }
  0xfc   : > { %v1722_v33 = vpop.f32.mrb[0].mxu1  ;;  %v1611_v34 = vpop.f32.mrb[1].mxu0 }
  0xfd   : > { %v1612_v35 = vadd.f32 %v1611_v34, %v1610_v32  ;;  %v1723_v36 = vpop.f32.mrb[1].mxu1  ;;  %v1613_v37 = vpop.f32.mrb[2].mxu0 }
  0xfe   : > { %v1724_v38 = vadd.f32 %v1723_v36, %v1722_v33  ;;  %v1725_v39 = vpop.f32.mrb[2].mxu1  ;;  %v1614_v40 = vpop.f32.mrb[3].mxu0 }
  0xff   : > { %v1615_v42 = vadd.f32 %v1614_v40, %v1613_v37  ;;  %v1726_v43 = vpop.f32.mrb[3].mxu1 }
 0x100   : > { %v1115_v44 = vadd.f32 %v1724_v38, %v1612_v35  ;;  %v1727_v45 = vadd.f32 %v1726_v43, %v1725_v39 }
 0x102   : > { %v1347_v46 = vadd.f32 %v2207_v41, %v1115_v44  ;;  %v1118_v47 = vadd.f32 %v1727_v45, %v1615_v42 }
 0x103   : > { %v1616_v48 = vpop.f32.mrb[4].mxu0 }
 0x104   : > { %1379 = vst [vmem:[%s2212_s20] sm:$0xff] %v1347_v46  ;;  %v1348_v49 = vadd.f32 %v2207_v41, %v1118_v47  ;;  %v1728_v50 = vpop.f32.mrb[4].mxu1  ;;  %v1617_v51 = vpop.f32.mrb[5].mxu0 }
 0x105   : > { %v1618_v52 = vadd.f32 %v1617_v51, %v1616_v48  ;;  %v1729_v53 = vpop.f32.mrb[5].mxu1  ;;  %v1619_v54 = vpop.f32.mrb[6].mxu0 }
 0x106   : > { %1380 = vst [vmem:[%s2212_s20 + $0x8] sm:$0xff] %v1348_v49  ;;  %v1730_v55 = vadd.f32 %v1729_v53, %v1728_v50  ;;  %v1731_v56 = vpop.f32.mrb[6].mxu1  ;;  %v1620_v57 = vpop.f32.mrb[7].mxu0 }
 0x107   : > { %v1621_v58 = vadd.f32 %v1620_v57, %v1619_v54  ;;  %v1732_v59 = vpop.f32.mrb[7].mxu1 }
 0x108   : > { %v1123_v60 = vadd.f32 %v1730_v55, %v1618_v52  ;;  %v1733_v61 = vadd.f32 %v1732_v59, %v1731_v56 }
 0x10a   : > { %v1349_v62 = vadd.f32 %v2207_v41, %v1123_v60  ;;  %v1126_v63 = vadd.f32 %v1733_v61, %v1621_v58 }
 0x10b   : > { %v1622_v0 = vpop.f32.mrb[8].mxu0 }
 0x10c   : > { %1381 = vst [vmem:[%s2212_s20 + $0x10] sm:$0xff] %v1349_v62  ;;  %v1350_v1 = vadd.f32 %v2207_v41, %v1126_v63  ;;  %v1734_v2 = vpop.f32.mrb[8].mxu1  ;;  %v1623_v3 = vpop.f32.mrb[9].mxu0 }
 0x10d   : > { %v1624_v4 = vadd.f32 %v1623_v3, %v1622_v0  ;;  %v1735_v5 = vpop.f32.mrb[9].mxu1  ;;  %v1625_v6 = vpop.f32.mrb[10].mxu0 }
 0x10e   : > { %1382 = vst [vmem:[%s2212_s20 + $0x18] sm:$0xff] %v1350_v1  ;;  %v1736_v7 = vadd.f32 %v1735_v5, %v1734_v2  ;;  %v1737_v8 = vpop.f32.mrb[10].mxu1  ;;  %v1626_v9 = vpop.f32.mrb[11].mxu0 }
 0x10f   : > { %v1627_v10 = vadd.f32 %v1626_v9, %v1625_v6  ;;  %v1738_v11 = vpop.f32.mrb[11].mxu1 }
 0x110   : > { %v1131_v12 = vadd.f32 %v1736_v7, %v1624_v4  ;;  %v1739_v13 = vadd.f32 %v1738_v11, %v1737_v8 }
 0x112   : > { %v1351_v14 = vadd.f32 %v2207_v41, %v1131_v12  ;;  %v1134_v15 = vadd.f32 %v1739_v13, %v1627_v10 }
 0x113   : > { %v1628_v16 = vpop.f32.mrb[12].mxu0 }
 0x114   : > { %1383 = vst [vmem:[%s2212_s20 + $0x20] sm:$0xff] %v1351_v14  ;;  %v1352_v17 = vadd.f32 %v2207_v41, %v1134_v15  ;;  %v1740_v18 = vpop.f32.mrb[12].mxu1  ;;  %v1629_v19 = vpop.f32.mrb[13].mxu0 }
 0x115   : > { %v1630_v20 = vadd.f32 %v1629_v19, %v1628_v16  ;;  %v1741_v21 = vpop.f32.mrb[13].mxu1  ;;  %v1631_v22 = vpop.f32.mrb[14].mxu0 }
 0x116   : > { %1384 = vst [vmem:[%s2212_s20 + $0x28] sm:$0xff] %v1352_v17  ;;  %v1742_v23 = vadd.f32 %v1741_v21, %v1740_v18  ;;  %v1743_v24 = vpop.f32.mrb[14].mxu1  ;;  %v1632_v25 = vpop.f32.mrb[15].mxu0 }
 0x117   : > { %v1633_v26 = vadd.f32 %v1632_v25, %v1631_v22  ;;  %v1744_v27 = vpop.f32.mrb[15].mxu1 }
 0x118   : > { %v1139_v28 = vadd.f32 %v1742_v23, %v1630_v20  ;;  %v1745_v29 = vadd.f32 %v1744_v27, %v1743_v24 }
 0x11a   : > { %v1353_v30 = vadd.f32 %v2207_v41, %v1139_v28  ;;  %v1142_v31 = vadd.f32 %v1745_v29, %v1633_v26 }
 0x11b   : > { %v1634_v32 = vpop.f32.mrb[16].mxu0 }
 0x11c   : > { %1385 = vst [vmem:[%s2212_s20 + $0x30] sm:$0xff] %v1353_v30  ;;  %v1354_v33 = vadd.f32 %v2207_v41, %v1142_v31  ;;  %v1746_v34 = vpop.f32.mrb[16].mxu1  ;;  %v1635_v35 = vpop.f32.mrb[17].mxu0 }
 0x11d   : > { %v1636_v36 = vadd.f32 %v1635_v35, %v1634_v32  ;;  %v1747_v37 = vpop.f32.mrb[17].mxu1  ;;  %v1637_v38 = vpop.f32.mrb[18].mxu0 }
 0x11e   : > { %1386 = vst [vmem:[%s2212_s20 + $0x38] sm:$0xff] %v1354_v33  ;;  %v1748_v39 = vadd.f32 %v1747_v37, %v1746_v34  ;;  %v1749_v40 = vpop.f32.mrb[18].mxu1  ;;  %v1638_v42 = vpop.f32.mrb[19].mxu0 }
 0x11f   : > { %v1639_v43 = vadd.f32 %v1638_v42, %v1637_v38  ;;  %v1750_v44 = vpop.f32.mrb[19].mxu1 }
 0x120   : > { %v1147_v45 = vadd.f32 %v1748_v39, %v1636_v36  ;;  %v1751_v46 = vadd.f32 %v1750_v44, %v1749_v40 }
 0x122   : > { %v1355_v47 = vadd.f32 %v2207_v41, %v1147_v45  ;;  %v1150_v48 = vadd.f32 %v1751_v46, %v1639_v43 }
 0x123   : > { %v1640_v49 = vpop.f32.mrb[20].mxu0 }
 0x124   : > { %1387 = vst [vmem:[%s2212_s20 + $0x40] sm:$0xff] %v1355_v47  ;;  %v1356_v50 = vadd.f32 %v2207_v41, %v1150_v48  ;;  %v1752_v51 = vpop.f32.mrb[20].mxu1  ;;  %v1641_v52 = vpop.f32.mrb[21].mxu0 }
 0x125   : > { %v1642_v53 = vadd.f32 %v1641_v52, %v1640_v49  ;;  %v1753_v54 = vpop.f32.mrb[21].mxu1  ;;  %v1643_v55 = vpop.f32.mrb[22].mxu0 }
 0x126   : > { %1388 = vst [vmem:[%s2212_s20 + $0x48] sm:$0xff] %v1356_v50  ;;  %v1754_v56 = vadd.f32 %v1753_v54, %v1752_v51  ;;  %v1755_v57 = vpop.f32.mrb[22].mxu1  ;;  %v1644_v58 = vpop.f32.mrb[23].mxu0 }
 0x127   : > { %v1645_v59 = vadd.f32 %v1644_v58, %v1643_v55  ;;  %v1756_v60 = vpop.f32.mrb[23].mxu1 }
 0x128   : > { %v1155_v61 = vadd.f32 %v1754_v56, %v1642_v53  ;;  %v1757_v62 = vadd.f32 %v1756_v60, %v1755_v57 }
 0x12a   : > { %v1357_v63 = vadd.f32 %v2207_v41, %v1155_v61  ;;  %v1158_v0 = vadd.f32 %v1757_v62, %v1645_v59 }
 0x12b   : > { %v1646_v1 = vpop.f32.mrb[24].mxu0 }
 0x12c   : > { %1389 = vst [vmem:[%s2212_s20 + $0x50] sm:$0xff] %v1357_v63  ;;  %v1358_v2 = vadd.f32 %v2207_v41, %v1158_v0  ;;  %v1758_v3 = vpop.f32.mrb[24].mxu1  ;;  %v1647_v4 = vpop.f32.mrb[25].mxu0 }
 0x12d   : > { %v1648_v5 = vadd.f32 %v1647_v4, %v1646_v1  ;;  %v1759_v6 = vpop.f32.mrb[25].mxu1  ;;  %v1649_v7 = vpop.f32.mrb[26].mxu0 }
 0x12e   : > { %1390 = vst [vmem:[%s2212_s20 + $0x58] sm:$0xff] %v1358_v2  ;;  %v1760_v8 = vadd.f32 %v1759_v6, %v1758_v3  ;;  %v1761_v9 = vpop.f32.mrb[26].mxu1  ;;  %v1650_v10 = vpop.f32.mrb[27].mxu0 }
 0x12f   : > { %v1651_v11 = vadd.f32 %v1650_v10, %v1649_v7  ;;  %v1762_v12 = vpop.f32.mrb[27].mxu1 }
 0x130   : > { %v1163_v13 = vadd.f32 %v1760_v8, %v1648_v5  ;;  %v1763_v14 = vadd.f32 %v1762_v12, %v1761_v9 }
 0x132   : > { %v1359_v15 = vadd.f32 %v2207_v41, %v1163_v13  ;;  %v1166_v16 = vadd.f32 %v1763_v14, %v1651_v11 }
 0x133   : > { %v1652_v17 = vpop.f32.mrb[28].mxu0 }
 0x134   : > { %1391 = vst [vmem:[%s2212_s20 + $0x60] sm:$0xff] %v1359_v15  ;;  %v1360_v18 = vadd.f32 %v2207_v41, %v1166_v16  ;;  %v1764_v19 = vpop.f32.mrb[28].mxu1  ;;  %v1653_v20 = vpop.f32.mrb[29].mxu0 }
 0x135   : > { %v1654_v21 = vadd.f32 %v1653_v20, %v1652_v17  ;;  %v1765_v22 = vpop.f32.mrb[29].mxu1  ;;  %v1655_v23 = vpop.f32.mrb[30].mxu0 }
 0x136   : > { %1392 = vst [vmem:[%s2212_s20 + $0x68] sm:$0xff] %v1360_v18  ;;  %v1766_v24 = vadd.f32 %v1765_v22, %v1764_v19  ;;  %v1767_v25 = vpop.f32.mrb[30].mxu1  ;;  %v1656_v26 = vpop.f32.mrb[31].mxu0 }
 0x137   : > { %v1657_v27 = vadd.f32 %v1656_v26, %v1655_v23  ;;  %v1768_v28 = vpop.f32.mrb[31].mxu1 }
 0x138   : > { %v1171_v29 = vadd.f32 %v1766_v24, %v1654_v21  ;;  %v1769_v30 = vadd.f32 %v1768_v28, %v1767_v25 }
 0x13a   : > { %v1361_v31 = vadd.f32 %v2207_v41, %v1171_v29  ;;  %v1174_v32 = vadd.f32 %v1769_v30, %v1657_v27 }
 0x13b   : > { %v1658_v33 = vpop.f32.mrb[32].mxu0 }
 0x13c   : > { %1393 = vst [vmem:[%s2212_s20 + $0x70] sm:$0xff] %v1361_v31  ;;  %v1362_v34 = vadd.f32 %v2207_v41, %v1174_v32  ;;  %v1770_v35 = vpop.f32.mrb[32].mxu1  ;;  %v1659_v36 = vpop.f32.mrb[33].mxu0 }
 0x13d   : > { %v1660_v37 = vadd.f32 %v1659_v36, %v1658_v33  ;;  %v1771_v38 = vpop.f32.mrb[33].mxu1  ;;  %v1661_v39 = vpop.f32.mrb[34].mxu0 }
 0x13e   : > { %1394 = vst [vmem:[%s2212_s20 + $0x78] sm:$0xff] %v1362_v34  ;;  %v1772_v40 = vadd.f32 %v1771_v38, %v1770_v35  ;;  %v1773_v42 = vpop.f32.mrb[34].mxu1  ;;  %v1662_v43 = vpop.f32.mrb[35].mxu0 }
 0x13f   : > { %v1663_v44 = vadd.f32 %v1662_v43, %v1661_v39  ;;  %v1774_v45 = vpop.f32.mrb[35].mxu1 }
 0x140   : > { %v1179_v46 = vadd.f32 %v1772_v40, %v1660_v37  ;;  %v1775_v47 = vadd.f32 %v1774_v45, %v1773_v42 }
 0x142   : > { %v1363_v48 = vadd.f32 %v2207_v41, %v1179_v46  ;;  %v1182_v49 = vadd.f32 %v1775_v47, %v1663_v44 }
 0x143   : > { %v1664_v50 = vpop.f32.mrb[36].mxu0 }
 0x144   : > { %1395 = vst [vmem:[%s2212_s20 + $0x80] sm:$0xff] %v1363_v48  ;;  %v1364_v51 = vadd.f32 %v2207_v41, %v1182_v49  ;;  %v1776_v52 = vpop.f32.mrb[36].mxu1  ;;  %v1665_v53 = vpop.f32.mrb[37].mxu0 }
 0x145   : > { %v1666_v54 = vadd.f32 %v1665_v53, %v1664_v50  ;;  %v1777_v55 = vpop.f32.mrb[37].mxu1  ;;  %v1667_v56 = vpop.f32.mrb[38].mxu0 }
 0x146   : > { %1396 = vst [vmem:[%s2212_s20 + $0x88] sm:$0xff] %v1364_v51  ;;  %v1778_v57 = vadd.f32 %v1777_v55, %v1776_v52  ;;  %v1779_v58 = vpop.f32.mrb[38].mxu1  ;;  %v1668_v59 = vpop.f32.mrb[39].mxu0 }
 0x147   : > { %v1669_v60 = vadd.f32 %v1668_v59, %v1667_v56  ;;  %v1780_v61 = vpop.f32.mrb[39].mxu1 }
 0x148   : > { %v1187_v62 = vadd.f32 %v1778_v57, %v1666_v54  ;;  %v1781_v63 = vadd.f32 %v1780_v61, %v1779_v58 }
 0x14a   : > { %v1365_v0 = vadd.f32 %v2207_v41, %v1187_v62  ;;  %v1190_v1 = vadd.f32 %v1781_v63, %v1669_v60 }
 0x14b   : > { %v1670_v2 = vpop.f32.mrb[40].mxu0 }
 0x14c   : > { %1397 = vst [vmem:[%s2212_s20 + $0x90] sm:$0xff] %v1365_v0  ;;  %v1366_v3 = vadd.f32 %v2207_v41, %v1190_v1  ;;  %v1782_v4 = vpop.f32.mrb[40].mxu1  ;;  %v1671_v5 = vpop.f32.mrb[41].mxu0 }
 0x14d   : > { %v1672_v6 = vadd.f32 %v1671_v5, %v1670_v2  ;;  %v1783_v7 = vpop.f32.mrb[41].mxu1  ;;  %v1673_v8 = vpop.f32.mrb[42].mxu0 }
 0x14e   : > { %1398 = vst [vmem:[%s2212_s20 + $0x98] sm:$0xff] %v1366_v3  ;;  %v1784_v9 = vadd.f32 %v1783_v7, %v1782_v4  ;;  %v1785_v10 = vpop.f32.mrb[42].mxu1  ;;  %v1674_v11 = vpop.f32.mrb[43].mxu0 }
 0x14f   : > { %v1675_v12 = vadd.f32 %v1674_v11, %v1673_v8  ;;  %v1786_v13 = vpop.f32.mrb[43].mxu1 }
 0x150   : > { %v1195_v14 = vadd.f32 %v1784_v9, %v1672_v6  ;;  %v1787_v15 = vadd.f32 %v1786_v13, %v1785_v10 }
 0x152   : > { %v1367_v16 = vadd.f32 %v2207_v41, %v1195_v14  ;;  %v1198_v17 = vadd.f32 %v1787_v15, %v1675_v12 }
 0x153   : > { %v1676_v18 = vpop.f32.mrb[44].mxu0 }
 0x154   : > { %1399 = vst [vmem:[%s2212_s20 + $0xa0] sm:$0xff] %v1367_v16  ;;  %v1368_v19 = vadd.f32 %v2207_v41, %v1198_v17  ;;  %v1788_v20 = vpop.f32.mrb[44].mxu1  ;;  %v1677_v21 = vpop.f32.mrb[45].mxu0 }
 0x155   : > { %v1678_v22 = vadd.f32 %v1677_v21, %v1676_v18  ;;  %v1789_v23 = vpop.f32.mrb[45].mxu1  ;;  %v1679_v24 = vpop.f32.mrb[46].mxu0 }
 0x156   : > { %1400 = vst [vmem:[%s2212_s20 + $0xa8] sm:$0xff] %v1368_v19  ;;  %v1790_v25 = vadd.f32 %v1789_v23, %v1788_v20  ;;  %v1791_v26 = vpop.f32.mrb[46].mxu1  ;;  %v1680_v27 = vpop.f32.mrb[47].mxu0 }
 0x157   : > { %v1681_v28 = vadd.f32 %v1680_v27, %v1679_v24  ;;  %v1792_v29 = vpop.f32.mrb[47].mxu1 }
 0x158   : > { %v1203_v30 = vadd.f32 %v1790_v25, %v1678_v22  ;;  %v1793_v31 = vadd.f32 %v1792_v29, %v1791_v26 }
 0x15a   : > { %v1369_v32 = vadd.f32 %v2207_v41, %v1203_v30  ;;  %v1206_v33 = vadd.f32 %v1793_v31, %v1681_v28 }
 0x15b   : > { %v1682_v34 = vpop.f32.mrb[48].mxu0 }
 0x15c   : > { %1401 = vst [vmem:[%s2212_s20 + $0xb0] sm:$0xff] %v1369_v32  ;;  %v1370_v35 = vadd.f32 %v2207_v41, %v1206_v33  ;;  %v1794_v36 = vpop.f32.mrb[48].mxu1  ;;  %v1683_v37 = vpop.f32.mrb[49].mxu0 }
 0x15d   : > { %v1684_v38 = vadd.f32 %v1683_v37, %v1682_v34  ;;  %v1795_v39 = vpop.f32.mrb[49].mxu1  ;;  %v1685_v40 = vpop.f32.mrb[50].mxu0 }
 0x15e   : > { %1402 = vst [vmem:[%s2212_s20 + $0xb8] sm:$0xff] %v1370_v35  ;;  %v1796_v42 = vadd.f32 %v1795_v39, %v1794_v36  ;;  %v1797_v43 = vpop.f32.mrb[50].mxu1  ;;  %v1686_v44 = vpop.f32.mrb[51].mxu0 }
 0x15f   : > { %v1687_v45 = vadd.f32 %v1686_v44, %v1685_v40  ;;  %v1798_v46 = vpop.f32.mrb[51].mxu1 }
 0x160   : > { %v1211_v47 = vadd.f32 %v1796_v42, %v1684_v38  ;;  %v1799_v48 = vadd.f32 %v1798_v46, %v1797_v43 }
 0x162   : > { %v1371_v49 = vadd.f32 %v2207_v41, %v1211_v47  ;;  %v1214_v50 = vadd.f32 %v1799_v48, %v1687_v45 }
 0x163   : > { %v1688_v51 = vpop.f32.mrb[52].mxu0 }
 0x164   : > { %1403 = vst [vmem:[%s2212_s20 + $0xc0] sm:$0xff] %v1371_v49  ;;  %v1372_v52 = vadd.f32 %v2207_v41, %v1214_v50  ;;  %v1800_v53 = vpop.f32.mrb[52].mxu1  ;;  %v1689_v54 = vpop.f32.mrb[53].mxu0 }
 0x165   : > { %v1690_v55 = vadd.f32 %v1689_v54, %v1688_v51  ;;  %v1801_v56 = vpop.f32.mrb[53].mxu1  ;;  %v1691_v57 = vpop.f32.mrb[54].mxu0 }
 0x166   : > { %1404 = vst [vmem:[%s2212_s20 + $0xc8] sm:$0xff] %v1372_v52  ;;  %v1802_v58 = vadd.f32 %v1801_v56, %v1800_v53  ;;  %v1803_v59 = vpop.f32.mrb[54].mxu1  ;;  %v1692_v60 = vpop.f32.mrb[55].mxu0 }
 0x167   : > { %v1693_v61 = vadd.f32 %v1692_v60, %v1691_v57  ;;  %v1804_v62 = vpop.f32.mrb[55].mxu1 }
 0x168   : > { %v1219_v63 = vadd.f32 %v1802_v58, %v1690_v55  ;;  %v1805_v0 = vadd.f32 %v1804_v62, %v1803_v59 }
 0x16a   : > { %v1373_v1 = vadd.f32 %v2207_v41, %v1219_v63  ;;  %v1222_v2 = vadd.f32 %v1805_v0, %v1693_v61 }
 0x16b   : > { %v1694_v3 = vpop.f32.mrb[56].mxu0 }
 0x16c   : > { %1405 = vst [vmem:[%s2212_s20 + $0xd0] sm:$0xff] %v1373_v1  ;;  %v1374_v4 = vadd.f32 %v2207_v41, %v1222_v2  ;;  %v1806_v5 = vpop.f32.mrb[56].mxu1  ;;  %v1695_v6 = vpop.f32.mrb[57].mxu0 }
 0x16d   : > { %v1696_v7 = vadd.f32 %v1695_v6, %v1694_v3  ;;  %v1807_v8 = vpop.f32.mrb[57].mxu1  ;;  %v1697_v9 = vpop.f32.mrb[58].mxu0 }
 0x16e   : > { %1406 = vst [vmem:[%s2212_s20 + $0xd8] sm:$0xff] %v1374_v4  ;;  %v1808_v10 = vadd.f32 %v1807_v8, %v1806_v5  ;;  %v1809_v11 = vpop.f32.mrb[58].mxu1  ;;  %v1698_v12 = vpop.f32.mrb[59].mxu0 }
 0x16f   : > { %v1699_v13 = vadd.f32 %v1698_v12, %v1697_v9  ;;  %v1810_v14 = vpop.f32.mrb[59].mxu1 }
 0x170   : > { %v1227_v15 = vadd.f32 %v1808_v10, %v1696_v7  ;;  %v1811_v16 = vadd.f32 %v1810_v14, %v1809_v11 }
 0x172   : > { %v1375_v17 = vadd.f32 %v2207_v41, %v1227_v15  ;;  %v1230_v18 = vadd.f32 %v1811_v16, %v1699_v13 }
 0x173   : > { %v1700_v19 = vpop.f32.mrb[60].mxu0 }
 0x174   : > { %1407 = vst [vmem:[%s2212_s20 + $0xe0] sm:$0xff] %v1375_v17  ;;  %v1376_v20 = vadd.f32 %v2207_v41, %v1230_v18  ;;  %v1812_v21 = vpop.f32.mrb[60].mxu1  ;;  %v1701_v22 = vpop.f32.mrb[61].mxu0 }
 0x175   : > { %v1702_v23 = vadd.f32 %v1701_v22, %v1700_v19  ;;  %v1813_v24 = vpop.f32.mrb[61].mxu1  ;;  %v1703_v25 = vpop.f32.mrb[62].mxu0 }
 0x176   : > { %1408 = vst [vmem:[%s2212_s20 + $0xe8] sm:$0xff] %v1376_v20  ;;  %v1814_v26 = vadd.f32 %v1813_v24, %v1812_v21  ;;  %v1815_v27 = vpop.f32.mrb[62].mxu1  ;;  %v1704_v28 = vpop.f32.mrb[63].mxu0 }
 0x177   : > { %v1705_v29 = vadd.f32 %v1704_v28, %v1703_v25  ;;  %v1816_v30 = vpop.f32.mrb[63].mxu1 }
 0x178   : > { %v1235_v31 = vadd.f32 %v1814_v26, %v1702_v23  ;;  %v1817_v32 = vadd.f32 %v1816_v30, %v1815_v27 }
 0x17a   : > { %v1377_v33 = vadd.f32 %v2207_v41, %v1235_v31  ;;  %v1238_v34 = vadd.f32 %v1817_v32, %v1705_v29 }
 0x17c   : > { %1409 = vst [vmem:[%s2212_s20 + $0xf0] sm:$0xff] %v1377_v33  ;;  %v1378_v35 = vadd.f32 %v2207_v41, %v1238_v34 }
 0x17e   : > { %1410 = vst [vmem:[%s2212_s20 + $0xf8] sm:$0xff] %v1378_v35 }
 0x17f PF: > { %s13_s14 = sadd.s32 1, %s1992_s14   ;;  %s2291_s12 = smov %s1988_s13 }
 0x180   : > { %p10_p5 = scmp.ge.s32.totalorder %s13_s14, 4   ;;  %s2292_s13 = smov %s2294_s15 }
 0x182   :  { %12 = sbr.rel (!%p10_p5) target bundleno = 2 (0x2), region = 71 }

</bundles_post_ra>
